<compile_context>
chip_gen: v7x
topology: tpu7x:2x2x1
jax: 0.10.0
libtpu: 0.0.40
codegen_flags: <defaults>
</compile_context>

<pallas_src>
import jax
import jax.numpy as jnp
from jax import lax
from jax.experimental import pallas as pl
from jax.experimental.pallas import tpu as pltpu


# ----------------------------- Pallas kernel --------------------------------
def _lstm_reg_kernel(x_ref,        # (S, B, I)
                     wih0_ref,     # (I, 4H)   = weight_ih_l0.T
                     whh0_ref,     # (H, 4H)   = weight_hh_l0.T
                     b0_ref,       # (1, 4H)   = bias_ih_l0 + bias_hh_l0
                     w1_ref,       # (2H, 4H)  = concat([weight_ih_l1.T, weight_hh_l1.T])
                     b1_ref,       # (1, 4H)   = bias_ih_l1 + bias_hh_l1
                     wfc_ref,      # (H, O)    = fc.weight.T
                     bfc_ref,      # (1, O)    = fc.bias
                     out_ref):     # (S, B, O)
    S, B, I = x_ref.shape
    H = whh0_ref.shape[0]
    O = wfc_ref.shape[1]

    # ---- hoisted layer-0 input projection (+ bias), all timesteps at once ----
    x_flat = x_ref[...].reshape(S * B, I)
    pre0 = (jnp.dot(x_flat, wih0_ref[...], preferred_element_type=jnp.float32)
            + b0_ref[...])                               # (S*B, 4H)

    # Load weights / pre-broadcast biases once (outside the recurrence).
    whh0 = whh0_ref[...]                                 # (H, 4H)
    w1 = w1_ref[...]                                     # (2H, 4H)
    b1 = jnp.broadcast_to(b1_ref[...], (B, 4 * H))       # (B, 4H), broadcast once

    def gate_act(gates):
        # Transcendentals on the full (B, 4H) vreg (EUP has its own slot);
        # slice the already-activated results per gate.
        sig = jax.nn.sigmoid(gates)
        tnh = jnp.tanh(gates)
        i_g = sig[:, 0 * H:1 * H]
        f_g = sig[:, 1 * H:2 * H]
        g_g = tnh[:, 2 * H:3 * H]
        o_g = sig[:, 3 * H:4 * H]
        return i_g, f_g, g_g, o_g

    zeros = jnp.zeros((B, H), jnp.float32)
    h0, c0, h1, c1 = zeros, zeros, zeros, zeros          # states live in registers
    h1_steps = []

    # S is small & static -> fully unrolled time loop (max scheduler visibility).
    for t in range(S):
        # layer 0: only the recurrent matmul remains on the serial chain
        g0 = pre0[t * B:(t + 1) * B, :] + jnp.dot(
            h0, whh0, preferred_element_type=jnp.float32)        # (B, 4H)
        i0, f0, gg0, o0 = gate_act(g0)
        c0 = f0 * c0 + i0 * gg0
        h0 = o0 * jnp.tanh(c0)

        # layer 1: fused [x; h] matmul against concatenated weights
        xh = jnp.concatenate([h0, h1], axis=-1)                  # (B, 2H)
        g1 = jnp.dot(xh, w1, preferred_element_type=jnp.float32) + b1
        i1, f1, gg1, o1 = gate_act(g1)
        c1 = f1 * c1 + i1 * gg1
        h1 = o1 * jnp.tanh(c1)
        h1_steps.append(h1)

    # ---- fc head, hoisted out of the recurrence: one matmul + one store ----
    hs = jnp.concatenate(h1_steps, axis=0)                       # (S*B, H)
    y = (jnp.dot(hs, wfc_ref[...], preferred_element_type=jnp.float32)
         + bfc_ref[...])                                         # (S*B, O)
    out_ref[...] = y.reshape(S, B, O).astype(out_ref.dtype)


# ------------------------------- wrapper -------------------------------------
def lstm_regression_forward(x, params):
    """x: (S, B, I) float32. Returns (S, B, O) float32."""
    S, B, I = x.shape
    H = params["whh0"].shape[0] // 4          # weight_hh_l0: (4H, H)
    O = params["wfc"].shape[0]                # fc.weight:    (O, H)

    # Pad batch to a multiple of 8 (f32 sublane count); slice back afterwards.
    B_pad = ((B + 7) // 8) * 8
    if B_pad != B:
        x_in = jnp.pad(x, ((0, 0), (0, B_pad - B), (0, 0)))
    else:
        x_in = x

    # Glue: transpose weights, fuse layer-1 weights, combine biases so the
    # kernel does plain (rows, K) @ (K, N) matmuls.
    wih0 = params["wih0"].T                                        # (I, 4H)
    whh0 = params["whh0"].T                                        # (H, 4H)
    b0 = (params["bih0"] + params["bhh0"]).reshape(1, 4 * H)
    w1 = jnp.concatenate([params["wih1"].T, params["whh1"].T], 0)  # (2H, 4H)
    b1 = (params["bih1"] + params["bhh1"]).reshape(1, 4 * H)
    wfc = params["wfc"].T                                          # (H, O)
    bfc = params["bfc"].reshape(1, O)

    vmem = pl.BlockSpec(memory_space=pltpu.MemorySpace.VMEM)
    out = pl.pallas_call(
        _lstm_reg_kernel,
        out_shape=jax.ShapeDtypeStruct((S, B_pad, O), jnp.float32),
        in_specs=[vmem] * 8,
        out_specs=vmem,
    )(x_in, wih0, whh0, b0, w1, b1, wfc, bfc)

    return out[:, :B, :]


# --------------------------- pure-JAX reference -------------------------------
def _reference_forward(x, params):
    H = params["whh0"].shape[0] // 4

    def run_layer(inp, wih, whh, bih, bhh):
        B = inp.shape[1]
        b = bih + bhh

        def step(carry, x_t):
            h, c = carry
            g = x_t @ wih.T + h @ whh.T + b
            i = jax.nn.sigmoid(g[:, 0 * H:1 * H])
            f = jax.nn.sigmoid(g[:, 1 * H:2 * H])
            gg = jnp.tanh(g[:, 2 * H:3 * H])
            o = jax.nn.sigmoid(g[:, 3 * H:4 * H])
            c = f * c + i * gg
            h = o * jnp.tanh(c)
            return (h, c), h

        init = (jnp.zeros((B, H), jnp.float32), jnp.zeros((B, H), jnp.float32))
        _, hs = lax.scan(step, init, inp)
        return hs

    y0 = run_layer(x, params["wih0"], params["whh0"], params["bih0"], params["bhh0"])
    y1 = run_layer(y0, params["wih1"], params["whh1"], params["bih1"], params["bhh1"])
    S, B, _ = y1.shape
    out = y1.reshape(S * B, H) @ params["wfc"].T + params["bfc"]
    return out.reshape(S, B, -1)


# ---------------------------------- main --------------------------------------
def _init_params(key, input_size, hidden_size, output_size):
    """Deterministic init mimicking PyTorch's uniform(-1/sqrt(H), 1/sqrt(H))."""
    ks = jax.random.split(key, 11)
    kH = 1.0 / jnp.sqrt(hidden_size)
    u = lambda k, shape, bound: jax.random.uniform(
        k, shape, jnp.float32, minval=-bound, maxval=bound)
    return {
        # layer 0
        "wih0": u(ks[0], (4 * hidden_size, input_size), kH),
        "whh0": u(ks[1], (4 * hidden_size, hidden_size), kH),
        "bih0": u(ks[2], (4 * hidden_size,), kH),
        "bhh0": u(ks[3], (4 * hidden_size,), kH),
        # layer 1
        "wih1": u(ks[4], (4 * hidden_size, hidden_size), kH),
        "whh1": u(ks[5], (4 * hidden_size, hidden_size), kH),
        "bih1": u(ks[6], (4 * hidden_size,), kH),
        "bhh1": u(ks[7], (4 * hidden_size,), kH),
        # fc
        "wfc": u(ks[8], (output_size, hidden_size), kH),
        "bfc": u(ks[9], (output_size,), kH),
    }


if __name__ == "__main__":
    SEQ, BATCH = 8, 4
    INPUT_SIZE, HIDDEN_SIZE, OUTPUT_SIZE = 8, 32, 1

    key = jax.random.PRNGKey(0)
    k_x, k_p = jax.random.split(key)
    x = jax.random.normal(k_x, (SEQ, BATCH, INPUT_SIZE), jnp.float32)
    params = _init_params(k_p, INPUT_SIZE, HIDDEN_SIZE, OUTPUT_SIZE)

    out = lstm_regression_forward(x, params)
    out = jax.block_until_ready(out)

    ref = _reference_forward(x, params)
    assert out.shape == (SEQ, BATCH, OUTPUT_SIZE), out.shape
    assert jnp.allclose(out, ref, rtol=2e-2, atol=2e-2), (
        float(jnp.max(jnp.abs(out - ref))))

    print("KERNEL_OK")
</pallas_src>

<mosaic_0001>
module attributes {stable_mosaic.version = 11 : i64} {
  func.func @_lstm_reg_kernel(%arg0: memref<8x8x8xf32, #tpu.memory_space<vmem>>, %arg1: memref<8x128xf32, #tpu.memory_space<vmem>>, %arg2: memref<32x128xf32, #tpu.memory_space<vmem>>, %arg3: memref<1x128xf32, #tpu.memory_space<vmem>>, %arg4: memref<64x128xf32, #tpu.memory_space<vmem>>, %arg5: memref<1x128xf32, #tpu.memory_space<vmem>>, %arg6: memref<32x1xf32, #tpu.memory_space<vmem>>, %arg7: memref<1x1xf32, #tpu.memory_space<vmem>>, %arg8: memref<8x8x1xf32, #tpu.memory_space<vmem>>) attributes {dimension_semantics = [], scalar_prefetch = 0 : i64, scratch_operands = 0 : i64, tpu.core_type = #tpu.core_type<tc>} {
    %c0 = arith.constant 0 : index
    %c0_0 = arith.constant 0 : index
    %c0_1 = arith.constant 0 : index
    %0 = vector.load %arg0[%c0, %c0_0, %c0_1] : memref<8x8x8xf32, #tpu.memory_space<vmem>>, vector<8x8x8xf32>
    %1 = vector.shape_cast %0 : vector<8x8x8xf32> to vector<64x8xf32>
    %c0_2 = arith.constant 0 : index
    %c0_3 = arith.constant 0 : index
    %2 = vector.load %arg1[%c0_2, %c0_3] : memref<8x128xf32, #tpu.memory_space<vmem>>, vector<8x128xf32>
    %cst = arith.constant dense<0.000000e+00> : vector<64x128xf32>
    %3 = tpu.matmul %1, %2, %cst {dimension_numbers = #tpu.dot_dimension_numbers<[1], [0], [0], [1], [0, 0, 1, 1], [], []>} : vector<64x8xf32>, vector<8x128xf32>, vector<64x128xf32> -> vector<64x128xf32>
    %c0_4 = arith.constant 0 : index
    %c0_5 = arith.constant 0 : index
    %4 = vector.load %arg3[%c0_4, %c0_5] : memref<1x128xf32, #tpu.memory_space<vmem>>, vector<1x128xf32>
    %5 = vector.broadcast %4 : vector<1x128xf32> to vector<64x128xf32>
    %6 = arith.addf %3, %5 : vector<64x128xf32>
    %c0_6 = arith.constant 0 : index
    %c0_7 = arith.constant 0 : index
    %7 = vector.load %arg2[%c0_6, %c0_7] : memref<32x128xf32, #tpu.memory_space<vmem>>, vector<32x128xf32>
    %c0_8 = arith.constant 0 : index
    %c0_9 = arith.constant 0 : index
    %8 = vector.load %arg4[%c0_8, %c0_9] : memref<64x128xf32, #tpu.memory_space<vmem>>, vector<64x128xf32>
    %c0_10 = arith.constant 0 : index
    %c0_11 = arith.constant 0 : index
    %9 = vector.load %arg5[%c0_10, %c0_11] : memref<1x128xf32, #tpu.memory_space<vmem>>, vector<1x128xf32>
    %10 = vector.shape_cast %9 : vector<1x128xf32> to vector<1x128xf32>
    %11 = vector.broadcast %10 : vector<1x128xf32> to vector<8x128xf32>
    %cst_12 = arith.constant 0.000000e+00 : f32
    %12 = vector.broadcast %cst_12 : f32 to vector<8x32xf32>
    %13 = vector.extract_strided_slice %6 {offsets = [0, 0], sizes = [8, 128], strides = [1, 1]} : vector<64x128xf32> to vector<8x128xf32>
    %cst_13 = arith.constant dense<0.000000e+00> : vector<8x128xf32>
    %14 = tpu.matmul %12, %7, %cst_13 {dimension_numbers = #tpu.dot_dimension_numbers<[1], [0], [0], [1], [0, 0, 1, 1], [], []>} : vector<8x32xf32>, vector<32x128xf32>, vector<8x128xf32> -> vector<8x128xf32>
    %15 = arith.addf %13, %14 : vector<8x128xf32>
    %16 = arith.negf %15 : vector<8x128xf32>
    %17 = math.exp %16 : vector<8x128xf32>
    %cst_14 = arith.constant 1.000000e+00 : f32
    %18 = vector.broadcast %cst_14 : f32 to vector<8x128xf32>
    %19 = arith.addf %18, %17 : vector<8x128xf32>
    %20 = arith.divf %18, %19 : vector<8x128xf32>
    %21 = math.tanh %15 : vector<8x128xf32>
    %22 = vector.extract_strided_slice %20 {offsets = [0, 0], sizes = [8, 32], strides = [1, 1]} : vector<8x128xf32> to vector<8x32xf32>
    %23 = vector.extract_strided_slice %20 {offsets = [0, 32], sizes = [8, 32], strides = [1, 1]} : vector<8x128xf32> to vector<8x32xf32>
    %24 = vector.extract_strided_slice %21 {offsets = [0, 64], sizes = [8, 32], strides = [1, 1]} : vector<8x128xf32> to vector<8x32xf32>
    %25 = vector.extract_strided_slice %20 {offsets = [0, 96], sizes = [8, 32], strides = [1, 1]} : vector<8x128xf32> to vector<8x32xf32>
    %26 = arith.mulf %23, %12 : vector<8x32xf32>
    %27 = arith.mulf %22, %24 : vector<8x32xf32>
    %28 = arith.addf %26, %27 : vector<8x32xf32>
    %29 = math.tanh %28 : vector<8x32xf32>
    %30 = arith.mulf %25, %29 : vector<8x32xf32>
    %31 = tpu.concatenate %30, %12 in 1 : vector<8x32xf32>, vector<8x32xf32> -> vector<8x64xf32>
    %cst_15 = arith.constant dense<0.000000e+00> : vector<8x128xf32>
    %32 = tpu.matmul %31, %8, %cst_15 {dimension_numbers = #tpu.dot_dimension_numbers<[1], [0], [0], [1], [0, 0, 1, 1], [], []>} : vector<8x64xf32>, vector<64x128xf32>, vector<8x128xf32> -> vector<8x128xf32>
    %33 = arith.addf %32, %11 : vector<8x128xf32>
    %34 = arith.negf %33 : vector<8x128xf32>
    %35 = math.exp %34 : vector<8x128xf32>
    %cst_16 = arith.constant 1.000000e+00 : f32
    %36 = vector.broadcast %cst_16 : f32 to vector<8x128xf32>
    %37 = arith.addf %36, %35 : vector<8x128xf32>
    %38 = arith.divf %36, %37 : vector<8x128xf32>
    %39 = math.tanh %33 : vector<8x128xf32>
    %40 = vector.extract_strided_slice %38 {offsets = [0, 0], sizes = [8, 32], strides = [1, 1]} : vector<8x128xf32> to vector<8x32xf32>
    %41 = vector.extract_strided_slice %38 {offsets = [0, 32], sizes = [8, 32], strides = [1, 1]} : vector<8x128xf32> to vector<8x32xf32>
    %42 = vector.extract_strided_slice %39 {offsets = [0, 64], sizes = [8, 32], strides = [1, 1]} : vector<8x128xf32> to vector<8x32xf32>
    %43 = vector.extract_strided_slice %38 {offsets = [0, 96], sizes = [8, 32], strides = [1, 1]} : vector<8x128xf32> to vector<8x32xf32>
    %44 = arith.mulf %41, %12 : vector<8x32xf32>
    %45 = arith.mulf %40, %42 : vector<8x32xf32>
    %46 = arith.addf %44, %45 : vector<8x32xf32>
    %47 = math.tanh %46 : vector<8x32xf32>
    %48 = arith.mulf %43, %47 : vector<8x32xf32>
    %49 = vector.extract_strided_slice %6 {offsets = [8, 0], sizes = [8, 128], strides = [1, 1]} : vector<64x128xf32> to vector<8x128xf32>
    %cst_17 = arith.constant dense<0.000000e+00> : vector<8x128xf32>
    %50 = tpu.matmul %30, %7, %cst_17 {dimension_numbers = #tpu.dot_dimension_numbers<[1], [0], [0], [1], [0, 0, 1, 1], [], []>} : vector<8x32xf32>, vector<32x128xf32>, vector<8x128xf32> -> vector<8x128xf32>
    %51 = arith.addf %49, %50 : vector<8x128xf32>
    %52 = arith.negf %51 : vector<8x128xf32>
    %53 = math.exp %52 : vector<8x128xf32>
    %cst_18 = arith.constant 1.000000e+00 : f32
    %54 = vector.broadcast %cst_18 : f32 to vector<8x128xf32>
    %55 = arith.addf %54, %53 : vector<8x128xf32>
    %56 = arith.divf %54, %55 : vector<8x128xf32>
    %57 = math.tanh %51 : vector<8x128xf32>
    %58 = vector.extract_strided_slice %56 {offsets = [0, 0], sizes = [8, 32], strides = [1, 1]} : vector<8x128xf32> to vector<8x32xf32>
    %59 = vector.extract_strided_slice %56 {offsets = [0, 32], sizes = [8, 32], strides = [1, 1]} : vector<8x128xf32> to vector<8x32xf32>
    %60 = vector.extract_strided_slice %57 {offsets = [0, 64], sizes = [8, 32], strides = [1, 1]} : vector<8x128xf32> to vector<8x32xf32>
    %61 = vector.extract_strided_slice %56 {offsets = [0, 96], sizes = [8, 32], strides = [1, 1]} : vector<8x128xf32> to vector<8x32xf32>
    %62 = arith.mulf %59, %28 : vector<8x32xf32>
    %63 = arith.mulf %58, %60 : vector<8x32xf32>
    %64 = arith.addf %62, %63 : vector<8x32xf32>
    %65 = math.tanh %64 : vector<8x32xf32>
    %66 = arith.mulf %61, %65 : vector<8x32xf32>
    %67 = tpu.concatenate %66, %48 in 1 : vector<8x32xf32>, vector<8x32xf32> -> vector<8x64xf32>
    %cst_19 = arith.constant dense<0.000000e+00> : vector<8x128xf32>
    %68 = tpu.matmul %67, %8, %cst_19 {dimension_numbers = #tpu.dot_dimension_numbers<[1], [0], [0], [1], [0, 0, 1, 1], [], []>} : vector<8x64xf32>, vector<64x128xf32>, vector<8x128xf32> -> vector<8x128xf32>
    %69 = arith.addf %68, %11 : vector<8x128xf32>
    %70 = arith.negf %69 : vector<8x128xf32>
    %71 = math.exp %70 : vector<8x128xf32>
    %cst_20 = arith.constant 1.000000e+00 : f32
    %72 = vector.broadcast %cst_20 : f32 to vector<8x128xf32>
    %73 = arith.addf %72, %71 : vector<8x128xf32>
    %74 = arith.divf %72, %73 : vector<8x128xf32>
    %75 = math.tanh %69 : vector<8x128xf32>
    %76 = vector.extract_strided_slice %74 {offsets = [0, 0], sizes = [8, 32], strides = [1, 1]} : vector<8x128xf32> to vector<8x32xf32>
    %77 = vector.extract_strided_slice %74 {offsets = [0, 32], sizes = [8, 32], strides = [1, 1]} : vector<8x128xf32> to vector<8x32xf32>
    %78 = vector.extract_strided_slice %75 {offsets = [0, 64], sizes = [8, 32], strides = [1, 1]} : vector<8x128xf32> to vector<8x32xf32>
    %79 = vector.extract_strided_slice %74 {offsets = [0, 96], sizes = [8, 32], strides = [1, 1]} : vector<8x128xf32> to vector<8x32xf32>
    %80 = arith.mulf %77, %46 : vector<8x32xf32>
    %81 = arith.mulf %76, %78 : vector<8x32xf32>
    %82 = arith.addf %80, %81 : vector<8x32xf32>
    %83 = math.tanh %82 : vector<8x32xf32>
    %84 = arith.mulf %79, %83 : vector<8x32xf32>
    %85 = vector.extract_strided_slice %6 {offsets = [16, 0], sizes = [8, 128], strides = [1, 1]} : vector<64x128xf32> to vector<8x128xf32>
    %cst_21 = arith.constant dense<0.000000e+00> : vector<8x128xf32>
    %86 = tpu.matmul %66, %7, %cst_21 {dimension_numbers = #tpu.dot_dimension_numbers<[1], [0], [0], [1], [0, 0, 1, 1], [], []>} : vector<8x32xf32>, vector<32x128xf32>, vector<8x128xf32> -> vector<8x128xf32>
    %87 = arith.addf %85, %86 : vector<8x128xf32>
    %88 = arith.negf %87 : vector<8x128xf32>
    %89 = math.exp %88 : vector<8x128xf32>
    %cst_22 = arith.constant 1.000000e+00 : f32
    %90 = vector.broadcast %cst_22 : f32 to vector<8x128xf32>
    %91 = arith.addf %90, %89 : vector<8x128xf32>
    %92 = arith.divf %90, %91 : vector<8x128xf32>
    %93 = math.tanh %87 : vector<8x128xf32>
    %94 = vector.extract_strided_slice %92 {offsets = [0, 0], sizes = [8, 32], strides = [1, 1]} : vector<8x128xf32> to vector<8x32xf32>
    %95 = vector.extract_strided_slice %92 {offsets = [0, 32], sizes = [8, 32], strides = [1, 1]} : vector<8x128xf32> to vector<8x32xf32>
    %96 = vector.extract_strided_slice %93 {offsets = [0, 64], sizes = [8, 32], strides = [1, 1]} : vector<8x128xf32> to vector<8x32xf32>
    %97 = vector.extract_strided_slice %92 {offsets = [0, 96], sizes = [8, 32], strides = [1, 1]} : vector<8x128xf32> to vector<8x32xf32>
    %98 = arith.mulf %95, %64 : vector<8x32xf32>
    %99 = arith.mulf %94, %96 : vector<8x32xf32>
    %100 = arith.addf %98, %99 : vector<8x32xf32>
    %101 = math.tanh %100 : vector<8x32xf32>
    %102 = arith.mulf %97, %101 : vector<8x32xf32>
    %103 = tpu.concatenate %102, %84 in 1 : vector<8x32xf32>, vector<8x32xf32> -> vector<8x64xf32>
    %cst_23 = arith.constant dense<0.000000e+00> : vector<8x128xf32>
    %104 = tpu.matmul %103, %8, %cst_23 {dimension_numbers = #tpu.dot_dimension_numbers<[1], [0], [0], [1], [0, 0, 1, 1], [], []>} : vector<8x64xf32>, vector<64x128xf32>, vector<8x128xf32> -> vector<8x128xf32>
    %105 = arith.addf %104, %11 : vector<8x128xf32>
    %106 = arith.negf %105 : vector<8x128xf32>
    %107 = math.exp %106 : vector<8x128xf32>
    %cst_24 = arith.constant 1.000000e+00 : f32
    %108 = vector.broadcast %cst_24 : f32 to vector<8x128xf32>
    %109 = arith.addf %108, %107 : vector<8x128xf32>
    %110 = arith.divf %108, %109 : vector<8x128xf32>
    %111 = math.tanh %105 : vector<8x128xf32>
    %112 = vector.extract_strided_slice %110 {offsets = [0, 0], sizes = [8, 32], strides = [1, 1]} : vector<8x128xf32> to vector<8x32xf32>
    %113 = vector.extract_strided_slice %110 {offsets = [0, 32], sizes = [8, 32], strides = [1, 1]} : vector<8x128xf32> to vector<8x32xf32>
    %114 = vector.extract_strided_slice %111 {offsets = [0, 64], sizes = [8, 32], strides = [1, 1]} : vector<8x128xf32> to vector<8x32xf32>
    %115 = vector.extract_strided_slice %110 {offsets = [0, 96], sizes = [8, 32], strides = [1, 1]} : vector<8x128xf32> to vector<8x32xf32>
    %116 = arith.mulf %113, %82 : vector<8x32xf32>
    %117 = arith.mulf %112, %114 : vector<8x32xf32>
    %118 = arith.addf %116, %117 : vector<8x32xf32>
    %119 = math.tanh %118 : vector<8x32xf32>
    %120 = arith.mulf %115, %119 : vector<8x32xf32>
    %121 = vector.extract_strided_slice %6 {offsets = [24, 0], sizes = [8, 128], strides = [1, 1]} : vector<64x128xf32> to vector<8x128xf32>
    %cst_25 = arith.constant dense<0.000000e+00> : vector<8x128xf32>
    %122 = tpu.matmul %102, %7, %cst_25 {dimension_numbers = #tpu.dot_dimension_numbers<[1], [0], [0], [1], [0, 0, 1, 1], [], []>} : vector<8x32xf32>, vector<32x128xf32>, vector<8x128xf32> -> vector<8x128xf32>
    %123 = arith.addf %121, %122 : vector<8x128xf32>
    %124 = arith.negf %123 : vector<8x128xf32>
    %125 = math.exp %124 : vector<8x128xf32>
    %cst_26 = arith.constant 1.000000e+00 : f32
    %126 = vector.broadcast %cst_26 : f32 to vector<8x128xf32>
    %127 = arith.addf %126, %125 : vector<8x128xf32>
    %128 = arith.divf %126, %127 : vector<8x128xf32>
    %129 = math.tanh %123 : vector<8x128xf32>
    %130 = vector.extract_strided_slice %128 {offsets = [0, 0], sizes = [8, 32], strides = [1, 1]} : vector<8x128xf32> to vector<8x32xf32>
    %131 = vector.extract_strided_slice %128 {offsets = [0, 32], sizes = [8, 32], strides = [1, 1]} : vector<8x128xf32> to vector<8x32xf32>
    %132 = vector.extract_strided_slice %129 {offsets = [0, 64], sizes = [8, 32], strides = [1, 1]} : vector<8x128xf32> to vector<8x32xf32>
    %133 = vector.extract_strided_slice %128 {offsets = [0, 96], sizes = [8, 32], strides = [1, 1]} : vector<8x128xf32> to vector<8x32xf32>
    %134 = arith.mulf %131, %100 : vector<8x32xf32>
    %135 = arith.mulf %130, %132 : vector<8x32xf32>
    %136 = arith.addf %134, %135 : vector<8x32xf32>
    %137 = math.tanh %136 : vector<8x32xf32>
    %138 = arith.mulf %133, %137 : vector<8x32xf32>
    %139 = tpu.concatenate %138, %120 in 1 : vector<8x32xf32>, vector<8x32xf32> -> vector<8x64xf32>
    %cst_27 = arith.constant dense<0.000000e+00> : vector<8x128xf32>
    %140 = tpu.matmul %139, %8, %cst_27 {dimension_numbers = #tpu.dot_dimension_numbers<[1], [0], [0], [1], [0, 0, 1, 1], [], []>} : vector<8x64xf32>, vector<64x128xf32>, vector<8x128xf32> -> vector<8x128xf32>
    %141 = arith.addf %140, %11 : vector<8x128xf32>
    %142 = arith.negf %141 : vector<8x128xf32>
    %143 = math.exp %142 : vector<8x128xf32>
    %cst_28 = arith.constant 1.000000e+00 : f32
    %144 = vector.broadcast %cst_28 : f32 to vector<8x128xf32>
    %145 = arith.addf %144, %143 : vector<8x128xf32>
    %146 = arith.divf %144, %145 : vector<8x128xf32>
    %147 = math.tanh %141 : vector<8x128xf32>
    %148 = vector.extract_strided_slice %146 {offsets = [0, 0], sizes = [8, 32], strides = [1, 1]} : vector<8x128xf32> to vector<8x32xf32>
    %149 = vector.extract_strided_slice %146 {offsets = [0, 32], sizes = [8, 32], strides = [1, 1]} : vector<8x128xf32> to vector<8x32xf32>
    %150 = vector.extract_strided_slice %147 {offsets = [0, 64], sizes = [8, 32], strides = [1, 1]} : vector<8x128xf32> to vector<8x32xf32>
    %151 = vector.extract_strided_slice %146 {offsets = [0, 96], sizes = [8, 32], strides = [1, 1]} : vector<8x128xf32> to vector<8x32xf32>
    %152 = arith.mulf %149, %118 : vector<8x32xf32>
    %153 = arith.mulf %148, %150 : vector<8x32xf32>
    %154 = arith.addf %152, %153 : vector<8x32xf32>
    %155 = math.tanh %154 : vector<8x32xf32>
    %156 = arith.mulf %151, %155 : vector<8x32xf32>
    %157 = vector.extract_strided_slice %6 {offsets = [32, 0], sizes = [8, 128], strides = [1, 1]} : vector<64x128xf32> to vector<8x128xf32>
    %cst_29 = arith.constant dense<0.000000e+00> : vector<8x128xf32>
    %158 = tpu.matmul %138, %7, %cst_29 {dimension_numbers = #tpu.dot_dimension_numbers<[1], [0], [0], [1], [0, 0, 1, 1], [], []>} : vector<8x32xf32>, vector<32x128xf32>, vector<8x128xf32> -> vector<8x128xf32>
    %159 = arith.addf %157, %158 : vector<8x128xf32>
    %160 = arith.negf %159 : vector<8x128xf32>
    %161 = math.exp %160 : vector<8x128xf32>
    %cst_30 = arith.constant 1.000000e+00 : f32
    %162 = vector.broadcast %cst_30 : f32 to vector<8x128xf32>
    %163 = arith.addf %162, %161 : vector<8x128xf32>
    %164 = arith.divf %162, %163 : vector<8x128xf32>
    %165 = math.tanh %159 : vector<8x128xf32>
    %166 = vector.extract_strided_slice %164 {offsets = [0, 0], sizes = [8, 32], strides = [1, 1]} : vector<8x128xf32> to vector<8x32xf32>
    %167 = vector.extract_strided_slice %164 {offsets = [0, 32], sizes = [8, 32], strides = [1, 1]} : vector<8x128xf32> to vector<8x32xf32>
    %168 = vector.extract_strided_slice %165 {offsets = [0, 64], sizes = [8, 32], strides = [1, 1]} : vector<8x128xf32> to vector<8x32xf32>
    %169 = vector.extract_strided_slice %164 {offsets = [0, 96], sizes = [8, 32], strides = [1, 1]} : vector<8x128xf32> to vector<8x32xf32>
    %170 = arith.mulf %167, %136 : vector<8x32xf32>
    %171 = arith.mulf %166, %168 : vector<8x32xf32>
    %172 = arith.addf %170, %171 : vector<8x32xf32>
    %173 = math.tanh %172 : vector<8x32xf32>
    %174 = arith.mulf %169, %173 : vector<8x32xf32>
    %175 = tpu.concatenate %174, %156 in 1 : vector<8x32xf32>, vector<8x32xf32> -> vector<8x64xf32>
    %cst_31 = arith.constant dense<0.000000e+00> : vector<8x128xf32>
    %176 = tpu.matmul %175, %8, %cst_31 {dimension_numbers = #tpu.dot_dimension_numbers<[1], [0], [0], [1], [0, 0, 1, 1], [], []>} : vector<8x64xf32>, vector<64x128xf32>, vector<8x128xf32> -> vector<8x128xf32>
    %177 = arith.addf %176, %11 : vector<8x128xf32>
    %178 = arith.negf %177 : vector<8x128xf32>
    %179 = math.exp %178 : vector<8x128xf32>
    %cst_32 = arith.constant 1.000000e+00 : f32
    %180 = vector.broadcast %cst_32 : f32 to vector<8x128xf32>
    %181 = arith.addf %180, %179 : vector<8x128xf32>
    %182 = arith.divf %180, %181 : vector<8x128xf32>
    %183 = math.tanh %177 : vector<8x128xf32>
    %184 = vector.extract_strided_slice %182 {offsets = [0, 0], sizes = [8, 32], strides = [1, 1]} : vector<8x128xf32> to vector<8x32xf32>
    %185 = vector.extract_strided_slice %182 {offsets = [0, 32], sizes = [8, 32], strides = [1, 1]} : vector<8x128xf32> to vector<8x32xf32>
    %186 = vector.extract_strided_slice %183 {offsets = [0, 64], sizes = [8, 32], strides = [1, 1]} : vector<8x128xf32> to vector<8x32xf32>
    %187 = vector.extract_strided_slice %182 {offsets = [0, 96], sizes = [8, 32], strides = [1, 1]} : vector<8x128xf32> to vector<8x32xf32>
    %188 = arith.mulf %185, %154 : vector<8x32xf32>
    %189 = arith.mulf %184, %186 : vector<8x32xf32>
    %190 = arith.addf %188, %189 : vector<8x32xf32>
    %191 = math.tanh %190 : vector<8x32xf32>
    %192 = arith.mulf %187, %191 : vector<8x32xf32>
    %193 = vector.extract_strided_slice %6 {offsets = [40, 0], sizes = [8, 128], strides = [1, 1]} : vector<64x128xf32> to vector<8x128xf32>
    %cst_33 = arith.constant dense<0.000000e+00> : vector<8x128xf32>
    %194 = tpu.matmul %174, %7, %cst_33 {dimension_numbers = #tpu.dot_dimension_numbers<[1], [0], [0], [1], [0, 0, 1, 1], [], []>} : vector<8x32xf32>, vector<32x128xf32>, vector<8x128xf32> -> vector<8x128xf32>
    %195 = arith.addf %193, %194 : vector<8x128xf32>
    %196 = arith.negf %195 : vector<8x128xf32>
    %197 = math.exp %196 : vector<8x128xf32>
    %cst_34 = arith.constant 1.000000e+00 : f32
    %198 = vector.broadcast %cst_34 : f32 to vector<8x128xf32>
    %199 = arith.addf %198, %197 : vector<8x128xf32>
    %200 = arith.divf %198, %199 : vector<8x128xf32>
    %201 = math.tanh %195 : vector<8x128xf32>
    %202 = vector.extract_strided_slice %200 {offsets = [0, 0], sizes = [8, 32], strides = [1, 1]} : vector<8x128xf32> to vector<8x32xf32>
    %203 = vector.extract_strided_slice %200 {offsets = [0, 32], sizes = [8, 32], strides = [1, 1]} : vector<8x128xf32> to vector<8x32xf32>
    %204 = vector.extract_strided_slice %201 {offsets = [0, 64], sizes = [8, 32], strides = [1, 1]} : vector<8x128xf32> to vector<8x32xf32>
    %205 = vector.extract_strided_slice %200 {offsets = [0, 96], sizes = [8, 32], strides = [1, 1]} : vector<8x128xf32> to vector<8x32xf32>
    %206 = arith.mulf %203, %172 : vector<8x32xf32>
    %207 = arith.mulf %202, %204 : vector<8x32xf32>
    %208 = arith.addf %206, %207 : vector<8x32xf32>
    %209 = math.tanh %208 : vector<8x32xf32>
    %210 = arith.mulf %205, %209 : vector<8x32xf32>
    %211 = tpu.concatenate %210, %192 in 1 : vector<8x32xf32>, vector<8x32xf32> -> vector<8x64xf32>
    %cst_35 = arith.constant dense<0.000000e+00> : vector<8x128xf32>
    %212 = tpu.matmul %211, %8, %cst_35 {dimension_numbers = #tpu.dot_dimension_numbers<[1], [0], [0], [1], [0, 0, 1, 1], [], []>} : vector<8x64xf32>, vector<64x128xf32>, vector<8x128xf32> -> vector<8x128xf32>
    %213 = arith.addf %212, %11 : vector<8x128xf32>
    %214 = arith.negf %213 : vector<8x128xf32>
    %215 = math.exp %214 : vector<8x128xf32>
    %cst_36 = arith.constant 1.000000e+00 : f32
    %216 = vector.broadcast %cst_36 : f32 to vector<8x128xf32>
    %217 = arith.addf %216, %215 : vector<8x128xf32>
    %218 = arith.divf %216, %217 : vector<8x128xf32>
    %219 = math.tanh %213 : vector<8x128xf32>
    %220 = vector.extract_strided_slice %218 {offsets = [0, 0], sizes = [8, 32], strides = [1, 1]} : vector<8x128xf32> to vector<8x32xf32>
    %221 = vector.extract_strided_slice %218 {offsets = [0, 32], sizes = [8, 32], strides = [1, 1]} : vector<8x128xf32> to vector<8x32xf32>
    %222 = vector.extract_strided_slice %219 {offsets = [0, 64], sizes = [8, 32], strides = [1, 1]} : vector<8x128xf32> to vector<8x32xf32>
    %223 = vector.extract_strided_slice %218 {offsets = [0, 96], sizes = [8, 32], strides = [1, 1]} : vector<8x128xf32> to vector<8x32xf32>
    %224 = arith.mulf %221, %190 : vector<8x32xf32>
    %225 = arith.mulf %220, %222 : vector<8x32xf32>
    %226 = arith.addf %224, %225 : vector<8x32xf32>
    %227 = math.tanh %226 : vector<8x32xf32>
    %228 = arith.mulf %223, %227 : vector<8x32xf32>
    %229 = vector.extract_strided_slice %6 {offsets = [48, 0], sizes = [8, 128], strides = [1, 1]} : vector<64x128xf32> to vector<8x128xf32>
    %cst_37 = arith.constant dense<0.000000e+00> : vector<8x128xf32>
    %230 = tpu.matmul %210, %7, %cst_37 {dimension_numbers = #tpu.dot_dimension_numbers<[1], [0], [0], [1], [0, 0, 1, 1], [], []>} : vector<8x32xf32>, vector<32x128xf32>, vector<8x128xf32> -> vector<8x128xf32>
    %231 = arith.addf %229, %230 : vector<8x128xf32>
    %232 = arith.negf %231 : vector<8x128xf32>
    %233 = math.exp %232 : vector<8x128xf32>
    %cst_38 = arith.constant 1.000000e+00 : f32
    %234 = vector.broadcast %cst_38 : f32 to vector<8x128xf32>
    %235 = arith.addf %234, %233 : vector<8x128xf32>
    %236 = arith.divf %234, %235 : vector<8x128xf32>
    %237 = math.tanh %231 : vector<8x128xf32>
    %238 = vector.extract_strided_slice %236 {offsets = [0, 0], sizes = [8, 32], strides = [1, 1]} : vector<8x128xf32> to vector<8x32xf32>
    %239 = vector.extract_strided_slice %236 {offsets = [0, 32], sizes = [8, 32], strides = [1, 1]} : vector<8x128xf32> to vector<8x32xf32>
    %240 = vector.extract_strided_slice %237 {offsets = [0, 64], sizes = [8, 32], strides = [1, 1]} : vector<8x128xf32> to vector<8x32xf32>
    %241 = vector.extract_strided_slice %236 {offsets = [0, 96], sizes = [8, 32], strides = [1, 1]} : vector<8x128xf32> to vector<8x32xf32>
    %242 = arith.mulf %239, %208 : vector<8x32xf32>
    %243 = arith.mulf %238, %240 : vector<8x32xf32>
    %244 = arith.addf %242, %243 : vector<8x32xf32>
    %245 = math.tanh %244 : vector<8x32xf32>
    %246 = arith.mulf %241, %245 : vector<8x32xf32>
    %247 = tpu.concatenate %246, %228 in 1 : vector<8x32xf32>, vector<8x32xf32> -> vector<8x64xf32>
    %cst_39 = arith.constant dense<0.000000e+00> : vector<8x128xf32>
    %248 = tpu.matmul %247, %8, %cst_39 {dimension_numbers = #tpu.dot_dimension_numbers<[1], [0], [0], [1], [0, 0, 1, 1], [], []>} : vector<8x64xf32>, vector<64x128xf32>, vector<8x128xf32> -> vector<8x128xf32>
    %249 = arith.addf %248, %11 : vector<8x128xf32>
    %250 = arith.negf %249 : vector<8x128xf32>
    %251 = math.exp %250 : vector<8x128xf32>
    %cst_40 = arith.constant 1.000000e+00 : f32
    %252 = vector.broadcast %cst_40 : f32 to vector<8x128xf32>
    %253 = arith.addf %252, %251 : vector<8x128xf32>
    %254 = arith.divf %252, %253 : vector<8x128xf32>
    %255 = math.tanh %249 : vector<8x128xf32>
    %256 = vector.extract_strided_slice %254 {offsets = [0, 0], sizes = [8, 32], strides = [1, 1]} : vector<8x128xf32> to vector<8x32xf32>
    %257 = vector.extract_strided_slice %254 {offsets = [0, 32], sizes = [8, 32], strides = [1, 1]} : vector<8x128xf32> to vector<8x32xf32>
    %258 = vector.extract_strided_slice %255 {offsets = [0, 64], sizes = [8, 32], strides = [1, 1]} : vector<8x128xf32> to vector<8x32xf32>
    %259 = vector.extract_strided_slice %254 {offsets = [0, 96], sizes = [8, 32], strides = [1, 1]} : vector<8x128xf32> to vector<8x32xf32>
    %260 = arith.mulf %257, %226 : vector<8x32xf32>
    %261 = arith.mulf %256, %258 : vector<8x32xf32>
    %262 = arith.addf %260, %261 : vector<8x32xf32>
    %263 = math.tanh %262 : vector<8x32xf32>
    %264 = arith.mulf %259, %263 : vector<8x32xf32>
    %265 = vector.extract_strided_slice %6 {offsets = [56, 0], sizes = [8, 128], strides = [1, 1]} : vector<64x128xf32> to vector<8x128xf32>
    %cst_41 = arith.constant dense<0.000000e+00> : vector<8x128xf32>
    %266 = tpu.matmul %246, %7, %cst_41 {dimension_numbers = #tpu.dot_dimension_numbers<[1], [0], [0], [1], [0, 0, 1, 1], [], []>} : vector<8x32xf32>, vector<32x128xf32>, vector<8x128xf32> -> vector<8x128xf32>
    %267 = arith.addf %265, %266 : vector<8x128xf32>
    %268 = arith.negf %267 : vector<8x128xf32>
    %269 = math.exp %268 : vector<8x128xf32>
    %cst_42 = arith.constant 1.000000e+00 : f32
    %270 = vector.broadcast %cst_42 : f32 to vector<8x128xf32>
    %271 = arith.addf %270, %269 : vector<8x128xf32>
    %272 = arith.divf %270, %271 : vector<8x128xf32>
    %273 = math.tanh %267 : vector<8x128xf32>
    %274 = vector.extract_strided_slice %272 {offsets = [0, 0], sizes = [8, 32], strides = [1, 1]} : vector<8x128xf32> to vector<8x32xf32>
    %275 = vector.extract_strided_slice %272 {offsets = [0, 32], sizes = [8, 32], strides = [1, 1]} : vector<8x128xf32> to vector<8x32xf32>
    %276 = vector.extract_strided_slice %273 {offsets = [0, 64], sizes = [8, 32], strides = [1, 1]} : vector<8x128xf32> to vector<8x32xf32>
    %277 = vector.extract_strided_slice %272 {offsets = [0, 96], sizes = [8, 32], strides = [1, 1]} : vector<8x128xf32> to vector<8x32xf32>
    %278 = arith.mulf %275, %244 : vector<8x32xf32>
    %279 = arith.mulf %274, %276 : vector<8x32xf32>
    %280 = arith.addf %278, %279 : vector<8x32xf32>
    %281 = math.tanh %280 : vector<8x32xf32>
    %282 = arith.mulf %277, %281 : vector<8x32xf32>
    %283 = tpu.concatenate %282, %264 in 1 : vector<8x32xf32>, vector<8x32xf32> -> vector<8x64xf32>
    %cst_43 = arith.constant dense<0.000000e+00> : vector<8x128xf32>
    %284 = tpu.matmul %283, %8, %cst_43 {dimension_numbers = #tpu.dot_dimension_numbers<[1], [0], [0], [1], [0, 0, 1, 1], [], []>} : vector<8x64xf32>, vector<64x128xf32>, vector<8x128xf32> -> vector<8x128xf32>
    %285 = arith.addf %284, %11 : vector<8x128xf32>
    %286 = arith.negf %285 : vector<8x128xf32>
    %287 = math.exp %286 : vector<8x128xf32>
    %cst_44 = arith.constant 1.000000e+00 : f32
    %288 = vector.broadcast %cst_44 : f32 to vector<8x128xf32>
    %289 = arith.addf %288, %287 : vector<8x128xf32>
    %290 = arith.divf %288, %289 : vector<8x128xf32>
    %291 = math.tanh %285 : vector<8x128xf32>
    %292 = vector.extract_strided_slice %290 {offsets = [0, 0], sizes = [8, 32], strides = [1, 1]} : vector<8x128xf32> to vector<8x32xf32>
    %293 = vector.extract_strided_slice %290 {offsets = [0, 32], sizes = [8, 32], strides = [1, 1]} : vector<8x128xf32> to vector<8x32xf32>
    %294 = vector.extract_strided_slice %291 {offsets = [0, 64], sizes = [8, 32], strides = [1, 1]} : vector<8x128xf32> to vector<8x32xf32>
    %295 = vector.extract_strided_slice %290 {offsets = [0, 96], sizes = [8, 32], strides = [1, 1]} : vector<8x128xf32> to vector<8x32xf32>
    %296 = arith.mulf %293, %262 : vector<8x32xf32>
    %297 = arith.mulf %292, %294 : vector<8x32xf32>
    %298 = arith.addf %296, %297 : vector<8x32xf32>
    %299 = math.tanh %298 : vector<8x32xf32>
    %300 = arith.mulf %295, %299 : vector<8x32xf32>
    %301 = tpu.concatenate %48, %84, %120, %156, %192, %228, %264, %300 in 0 : vector<8x32xf32>, vector<8x32xf32>, vector<8x32xf32>, vector<8x32xf32>, vector<8x32xf32>, vector<8x32xf32>, vector<8x32xf32>, vector<8x32xf32> -> vector<64x32xf32>
    %c0_45 = arith.constant 0 : index
    %c0_46 = arith.constant 0 : index
    %302 = vector.load %arg6[%c0_45, %c0_46] : memref<32x1xf32, #tpu.memory_space<vmem>>, vector<32x1xf32>
    %cst_47 = arith.constant dense<0.000000e+00> : vector<64x1xf32>
    %303 = tpu.matmul %301, %302, %cst_47 {dimension_numbers = #tpu.dot_dimension_numbers<[1], [0], [0], [1], [0, 0, 1, 1], [], []>} : vector<64x32xf32>, vector<32x1xf32>, vector<64x1xf32> -> vector<64x1xf32>
    %c0_48 = arith.constant 0 : index
    %c0_49 = arith.constant 0 : index
    %304 = vector.load %arg7[%c0_48, %c0_49] : memref<1x1xf32, #tpu.memory_space<vmem>>, vector<1x1xf32>
    %305 = vector.broadcast %304 : vector<1x1xf32> to vector<64x1xf32>
    %306 = arith.addf %303, %305 : vector<64x1xf32>
    %307 = vector.shape_cast %306 : vector<64x1xf32> to vector<8x8x1xf32>
    %c0_50 = arith.constant 0 : index
    %c0_51 = arith.constant 0 : index
    %c0_52 = arith.constant 0 : index
    %308 = vector.load %arg8[%c0_50, %c0_51, %c0_52] : memref<8x8x1xf32, #tpu.memory_space<vmem>>, vector<8x8x1xf32>
    tpu.vector_store %arg8[%c0_50, %c0_51, %c0_52], %307 {strides = array<i32>} : memref<8x8x1xf32, #tpu.memory_space<vmem>>, vector<8x8x1xf32>,
    return
  }
}

</mosaic_0001>

<bundles_post_ra>
// kernel: tpu_custom_call.1
= control target key start
LH: loop header
LB: loop body
LE: loop exit
PB: predicated region body
PF: predicated region fallthrough
CT: control target
= control target key end

     0   :  { %s3311_s0 = inlined_call_operand.hbm [shape: f32[8,8,8], index: 0, kind: input, shape index: {}]   ;;  %s3312_s1 = inlined_call_operand.vmem [shape: f32[8,128], index: 1, kind: input, shape index: {}]   ;;  %s3313_s2 = inlined_call_operand.vmem [shape: f32[32,128], index: 2, kind: input, shape index: {}]   ;;  %s3314_s3 = inlined_call_operand.vmem [shape: f32[1,128], index: 3, kind: input, shape index: {}]   ;;  %s3315_s4 = inlined_call_operand.hbm [shape: f32[64,128], index: 4, kind: input, shape index: {}]   ;;  %s3316_s5 = inlined_call_operand.vmem [shape: f32[1,128], index: 5, kind: input, shape index: {}]   ;;  %s3317_s6 = inlined_call_operand.vmem [shape: f32[32,1], index: 6, kind: input, shape index: {}]   ;;  %s3318_s7 = inlined_call_operand.<no memory space> [shape: f32[1,1], index: 7, kind: input, shape index: {}]   ;;  %s3319_s8 = inlined_call_operand.vmem [shape: f32[8,8,1], index: 8, kind: output, shape index: {}]  }
   0x1   :  { %v13_v0 = vstv %s3318_s7 }
   0x2   :  { %14 = vst [vmem:[#allocation2] sm:$0x1] %v13_v0 }
   0x3   :  { %15 = vsyncpa [#allocation4], 0 }
   0x4   :  { %16 = vsyncpa [#allocation6], 0  ;;  %s2805_s29 = smov [#allocation3]   ;;  %s2757_s11 = scalar_lea.hbm %s3311_s0, 1024 }
   0x5   :  { %s22_s30 = sshll.u32 %s2805_s29, 4  ;;  %p2758_p0 = scmp.ne.s32.totalorder %s3311_s0, %s2757_s11  ;;  %s23_s30 = int_to_ptr.vmem [resolvable:$true] %s22_s30 }
   0x6   :  { %p2761_p1 = scmp.lt.u32.totalorder %s2757_s11, %s3311_s0 }
   0x8   :  { %p2763_p2 = pnand %p2761_p1, %p2758_p0 }
   0xa   :  { %2766 = shalt.err (!%p2763_p2)
}
   0xb   :  { %s2767_s7 = scalar_lea.vmem %s23_s30, 1024  ;;  %p2772_p4 = scmp.lt.s32.totalorder %s23_s30, %s23_s30 }
   0xc   :  { %p2768_p3 = scmp.ne.s32.totalorder %s23_s30, %s2767_s7  ;;  %p2773_p5 = scmp.lt.s32.totalorder %s2767_s7, %s2767_s7 }
   0xe   :  { %p2774_p6 = por %p2773_p5, %p2772_p4 }
  0x10   :  { %p2775_p7 = pnand %p2774_p6, %p2768_p3 }
  0x12   :  { %2778 = shalt.err (!%p2775_p7)
}
  0x13   :  { %s2806_s16 = smov 128   ;;  %s2807_s17 = smov 8  }
  0x14   :  { %28 = dma.hbm_to_vmem [thread:$0]  %s3311_s0, 1024, %s23_s30, [#allocation4], %s2806_s16, %s2806_s16, %s2807_s17  }
  0x15   :  { %s2808_s20 = smov [#allocation5]   ;;  %s2779_s24 = scalar_lea.hbm %s3315_s4, 1024 }
  0x16   :  { %s40_s21 = sshll.u32 %s2808_s20, 4  ;;  %p2780_p8 = scmp.ne.s32.totalorder %s3315_s4, %s2779_s24  ;;  %s41_s21 = int_to_ptr.vmem [resolvable:$true] %s40_s21 }
  0x17   :  { %p2783_p9 = scmp.lt.u32.totalorder %s2779_s24, %s3315_s4 }
  0x19   :  { %p2785_p10 = pnand %p2783_p9, %p2780_p8 }
  0x1b   :  { %2788 = shalt.err (!%p2785_p10)
}
  0x1c   :  { %s2789_s29 = scalar_lea.vmem %s41_s21, 1024  ;;  %p2794_p12 = scmp.lt.s32.totalorder %s41_s21, %s41_s21 }
  0x1d   :  { %p2790_p11 = scmp.ne.s32.totalorder %s41_s21, %s2789_s29  ;;  %p2795_p13 = scmp.lt.s32.totalorder %s2789_s29, %s2789_s29 }
  0x1f   :  { %p2796_p0 = por %p2795_p13, %p2794_p12 }
  0x21   :  { %p2797_p1 = pnand %p2796_p0, %p2790_p11 }
  0x23   :  { %2800 = shalt.err (!%p2797_p1)
}
  0x24   :  { %46 = dma.hbm_to_vmem [thread:$0]  %s3315_s4, 1024, %s41_s21, [#allocation6], %s2806_s16, %s2806_s16, %s2807_s17  }
  0x25   :  { %2801 = dma.done.wait [#allocation4], 1024  }
  0x26   :  { %2802 = vsyncadd [#allocation4], 4294966272 }
  0x27   :  { %2803 = dma.done.wait [#allocation6], 1024  }
  0x28   :  { %2804 = vsyncadd [#allocation6], 4294966272  ;;  %v2809_v1 = vmov 0.0|0.0   ;;  %vm2810_vm0 = vmmov 0   ;;  %v2811_v2 = vmov 0.0   ;;  %vm75_vm1 = vcmask 64512  }
  0x29   :  { %2468 = vmatprep.subr.bf16.mxu1 %v2809_v1  ;;  %2216 = vmatprep.mubr.msk.f32.mxu1 %vm2810_vm0, %v2811_v2  ;;  %v205_v3 = vld [vmem:[%s3313_s2] sm:$0xff]  ;;  %v206_v4 = vld [vmem:[%s3313_s2 + $0x8] sm:$0xff]  ;;  %v207_v9 = vld [vmem:[%s3313_s2 + $0x10] sm:$0xff]  ;;  %s2812_s17 = smov 64   ;;  %vm224_vm2 = vcmask 261120   ;;  %vm328_vm3 = vcmask 523264  }
  0x2a   :  { %v67_v5 = vld [vmem:[%s3312_s1] sm:$0xff]  ;;  %v2898_v6 = vpack.c.bf16 %v206_v4, %v205_v3  ;;  %v60_v8 = vld [vmem:[#allocation3 + $0x8] sm:$0xff]  ;;  %v208_v10 = vld [vmem:[%s3313_s2 + $0x18] sm:$0xff]  ;;  %vm1996_vm4 = vcmask 7168  }
  0x2b   :  { %2194 = vmatprep.subr.mxu0 %v67_v5  ;;  %v59_v7 = vld [vmem:[#allocation3] sm:$0xff]  ;;  %v2909_v11 = vpack.c.bf16 %v208_v10, %v207_v9  ;;  %v2927_v13 = vld [vmem:[%s3314_s3] ss:$0 sm:$0xff]  ;;  %s2813_s3 = smov 32   ;;  %v210_v30 = vld [vmem:[#allocation5 + $0x8] sm:$0xff] }
  0x2c   :  { %2195 = vmatpush3.msra.mxu0 %v67_v5  ;;  %2196 = vmatprep.mubr.msk.f32.mxu0 %vm75_vm1, %v59_v7  ;;  %v209_v29 = vld [vmem:[#allocation5] sm:$0xff]  ;;  %v61_v31 = vld [vmem:[#allocation3 + $0x10] sm:$0xff]  ;;  %v62_v33 = vld [vmem:[#allocation3 + $0x18] sm:$0xff] }
  0x2d   :  { %2470 = vmatpush3.bf16.msra.mxu1 %v2898_v6  ;;  %2197 = vmatmul.mubr.msk.f32.vlgmr.msra.gmra.mrb[0].mxu0 %vm75_vm1, %v60_v8  ;;  %v2935_v32 = vpack.c.bf16 %v210_v30, %v209_v29  ;;  %v211_v34 = vld [vmem:[#allocation5 + $0x10] sm:$0xff]  ;;  %v212_v35 = vld [vmem:[#allocation5 + $0x18] sm:$0xff]  ;;  %v63_v36 = vld [vmem:[#allocation3 + $0x20] sm:$0xff] }
  0x2e   :  { %2471 = vmatprep.subr.bf16.mxu1 %v2809_v1  ;;  %2474 = vmatprep.subr.bf16.mxu0 %v2809_v1  ;;  %v2940_v37 = vpack.c.bf16 %v212_v35, %v211_v34  ;;  %v64_v38 = vld [vmem:[#allocation3 + $0x28] sm:$0xff]  ;;  %v213_v39 = vld [vmem:[#allocation5 + $0x20] sm:$0xff]  ;;  %v65_v41 = vld [vmem:[#allocation3 + $0x30] sm:$0xff] }
  0x2f   :  { %2199 = vmatprep.mubr.msk.f32.mxu0 %vm75_vm1, %v61_v31  ;;  %2476 = vmatpush3.bf16.msra.mxu0 %v2935_v32  ;;  %v214_v40 = vld [vmem:[#allocation5 + $0x28] sm:$0xff]  ;;  %v66_v43 = vld [vmem:[#allocation3 + $0x38] sm:$0xff]  ;;  %v215_v44 = vld [vmem:[#allocation5 + $0x30] sm:$0xff] }
  0x30   :  { %2477 = vmatprep.subr.bf16.mxu0 %v2809_v1  ;;  %v2946_v42 = vpack.c.bf16 %v214_v40, %v213_v39  ;;  %v216_v45 = vld [vmem:[#allocation5 + $0x38] sm:$0xff] }
  0x31   :  { %2473 = vmatpush3.bf16.msra.mxu1 %v2909_v11  ;;  %2200 = vmatmul.mubr.msk.f32.gmra.mrb[2].mxu0 %vm75_vm1, %v62_v33  ;;  %v2953_v47 = vpack.c.bf16 %v216_v45, %v215_v44  ;;  %v2997_v59 = vld [vmem:[%s3316_s5] ss:$0 sm:$0xff] }
  0x32   :  { %2486 = vmatprep.subr.bf16.mxu1 %v2809_v1  ;;  %2202 = vmatprep.mubr.msk.f32.mxu0 %vm75_vm1, %v63_v36 }
  0x33   :  { %2479 = vmatpush3.bf16.msra.mxu0 %v2940_v37 }
  0x34   :  { %2217 = vmatmul.mubr.f32.vlgmr.msra.gmra.mrb[0].mxu1 %v2811_v2  ;;  %2480 = vmatprep.subr.bf16.mxu0 %v2809_v1 }
  0x35   :  { %2488 = vmatpush3.bf16.msra.mxu1 %v2898_v6  ;;  %2246 = vmatprep.mubr.msk.f32.mxu1 %vm2810_vm0, %v2811_v2 }
  0x36   :  { %2489 = vmatprep.subr.bf16.mxu1 %v2809_v1  ;;  %2203 = vmatmul.mubr.msk.f32.gmra.mrb[4].mxu0 %vm75_vm1, %v64_v38 }
  0x37   :  { %2205 = vmatprep.mubr.msk.f32.mxu0 %vm75_vm1, %v65_v41  ;;  %2482 = vmatpush3.bf16.msra.mxu0 %v2946_v42 }
  0x38   :  { %2483 = vmatprep.subr.bf16.mxu0 %v2809_v1 }
  0x39   :  { %2491 = vmatpush3.bf16.msra.mxu1 %v2909_v11 }
  0x3a   :  { %2492 = vmatprep.subr.bf16.mxu1 %v2809_v1  ;;  %2206 = vmatmul.mubr.msk.f32.gmra.mrb[6].mxu0 %vm75_vm1, %v66_v43 }
  0x3b   :  { %2235 = vmatprep.mubr.msk.f32.mxu0 %vm2810_vm0, %v2811_v2  ;;  %2485 = vmatpush3.bf16.msra.mxu0 %v2953_v47 }
  0x3c   :  { %2504 = vmatprep.subr.bf16.mxu0 %v2809_v1 }
 0x100   :  { %v2922_v12 = vpop.f32.mrb[0].mxu0 }
 0x101   :  { %v166_v14 = vpop.f32.mrb[1].mxu0  ;;  %v172_v58 = vadd.f32 %v2922_v12, %v2927_v13 }
 0x102   :  { %v167_v15 = vadd.f32 %v2927_v13, %v166_v14 }
 0x104   :  { %v2961_v50 = vpop.f32.mrb[2].mxu0 }
 0x105   :  { %v2963_v51 = vpop.f32.mrb[3].mxu0 }
 0x106   :  { %v177_v38 = vadd.f32 %v2927_v13, %v2963_v51 }
 0x107   :  { %v294_v16 = vpop.f32.mrb[0].mxu1 }
 0x108   :  { %v298_v17 = vadd.f32 %v294_v16, %v167_v15  ;;  %v2218_v18 = vpop.f32.mrb[1].mxu1 }
 0x109   :  { %v2965_v52 = vpop.f32.mrb[4].mxu0 }
 0x10a   :  { %2629 = vtanh.f32 %v298_v17  ;;  %v2021_v20 = vmul.f32 -1.442695, %v298_v17  ;;  %v2967_v53 = vpop.f32.mrb[5].mxu0 }
 0x10c   :  { %2631 = vpow2.f32 %v2021_v20 }
 0x10d   :  { %v2969_v54 = vpop.f32.mrb[6].mxu0 }
 0x10e   :  { %v2971_v55 = vpop.f32.mrb[7].mxu0 }
 0x114   :  { %v2630_v19 = vpop.eup %2629 }
 0x115   :  { %308 = vrot.lane.b32.xlu0 %v2630_v19, %s2812_s17 }
 0x116   :  { %v2632_v21 = vpop.eup %2631 }
 0x117   :  { %v302_v22 = vadd.f32 1.0, %v2632_v21 }
 0x119   :  { %2633 = vrcp.f32 %v302_v22 }
 0x123   :  { %v2634_v23 = vpop.eup %2633 }
 0x124   :  { %v306_v26 = vmul.f32 0.0, %v2634_v23 }
 0x187   :  { %v309_v24 = vpop.permute.xlu0 %308 }
 0x188   :  { %v311_v25 = vmul.f32 %v2634_v23, %v309_v24 }
 0x18a   :  { %313 = vrot.lane.b32.xlu0 %v311_v25, %s2813_s3 }
 0x1fc   :  { %v314_v27 = vpop.permute.xlu0 %313 }
 0x1fd   :  { %v2932_v28 = vadd.f32 %v314_v27, %v306_v26 }
 0x1ff   :  { %2635 = vtanh.f32 %v2932_v28 }
 0x209   :  { %v2636_v46 = vpop.eup %2635 }
 0x20a   :  { %319 = vrot.lane.b32.xlu1 %v2636_v46, %s2812_s17 }
 0x27c   :  { %v320_v48 = vpop.permute.xlu1 %319 }
 0x27d   :  { %v322_v49 = vmul.f32 %v2634_v23, %v320_v48 }
 0x27f   :  { %324 = vrot.lane.b32.xlu1 %v322_v49, %s2813_s3 }
 0x2f1   :  { %v325_v56 = vpop.permute.xlu1 %324 }
 0x2f2   :  { %v327_v57 = vsel %vm224_vm2, %v325_v56, 0.0  ;;  %2247 = vmatmul.mubr.msk.f32.vlgmr.msra.gmra.mrb[2].mxu1 %vm224_vm2, %v325_v56 }
 0x2f3   :  { %2236 = vmatmul.mubr.msk.f32.vlgmr.msra.gmra.mrb[8].mxu0 %vm328_vm3, %v327_v57  ;;  %2494 = vmatpush3.bf16.msra.mxu1 %v2935_v32 }
 0x2f4   :  { %2495 = vmatprep.subr.bf16.mxu1 %v2809_v1  ;;  %2506 = vmatpush3.bf16.msra.mxu0 %v2898_v6 }
 0x2f5   :  { %2507 = vmatprep.subr.bf16.mxu0 %v2809_v1  ;;  %2276 = vmatprep.mubr.msk.f32.mxu0 %vm2810_vm0, %v2811_v2 }
 0x2f6   :  { %2265 = vmatprep.mubr.msk.f32.mxu1 %vm2810_vm0, %v2811_v2 }
 0x2f7   :  { %2497 = vmatpush3.bf16.msra.mxu1 %v2940_v37 }
 0x2f8   :  { %2498 = vmatprep.subr.bf16.mxu1 %v2809_v1  ;;  %2509 = vmatpush3.bf16.msra.mxu0 %v2909_v11 }
 0x2f9   :  { %2510 = vmatprep.subr.bf16.mxu0 %v2809_v1 }
 0x2fb   :  { %2500 = vmatpush3.bf16.msra.mxu1 %v2946_v42 }
 0x2fc   :  { %2501 = vmatprep.subr.bf16.mxu1 %v2809_v1 }
 0x2ff   :  { %2503 = vmatpush3.bf16.msra.mxu1 %v2953_v47 }
 0x300   :  { %2522 = vmatprep.subr.bf16.mxu1 %v2809_v1 }
 0x3c5   :  { %v494_v60 = vpop.f32.mrb[2].mxu1 }
 0x3c6   :  { %v498_v61 = vadd.f32 %v494_v60, %v172_v58  ;;  %v398_v62 = vpop.f32.mrb[8].mxu0  ;;  %v2248_v63 = vpop.f32.mrb[3].mxu1 }
 0x3c7   :  { %v399_v0 = vadd.f32 %v2997_v59, %v398_v62  ;;  %v2237_v3 = vpop.f32.mrb[9].mxu0 }
 0x3c8   :  { %2637 = vtanh.f32 %v498_v61  ;;  %v2025_v7 = vmul.f32 -1.442695, %v498_v61 }
 0x3c9   :  { %2639 = vtanh.f32 %v399_v0  ;;  %v2023_v8 = vmul.f32 -1.442695, %v399_v0 }
 0x3ca   :  { %2641 = vpow2.f32 %v2025_v7 }
 0x3cb   :  { %2643 = vpow2.f32 %v2023_v8 }
 0x3d2   :  { %v2638_v4 = vpop.eup %2637 }
 0x3d3   :  { %v2640_v5 = vpop.eup %2639  ;;  %508 = vrot.lane.b32.xlu1 %v2638_v4, %s2812_s17 }
 0x3d4   :  { %411 = vrot.lane.b32.xlu0 %v2640_v5, %s2812_s17  ;;  %v2642_v9 = vpop.eup %2641 }
 0x3d5   :  { %v2644_v10 = vpop.eup %2643  ;;  %v502_v12 = vadd.f32 1.0, %v2642_v9 }
 0x3d6   :  { %v405_v14 = vadd.f32 1.0, %v2644_v10 }
 0x3d7   :  { %2645 = vrcp.f32 %v502_v12 }
 0x3d8   :  { %2647 = vrcp.f32 %v405_v14 }
 0x3e1   :  { %v2646_v15 = vpop.eup %2645 }
 0x3e2   :  { %v2648_v17 = vpop.eup %2647  ;;  %v506_v21 = vmul.f32 %v2646_v15, %v2932_v28 }
 0x3e3   :  { %v409_v23 = vmul.f32 0.0, %v2648_v17 }
 0x445   :  { %v509_v16 = vpop.permute.xlu1 %508 }
 0x446   :  { %v511_v18 = vmul.f32 %v2646_v15, %v509_v16  ;;  %v412_v19 = vpop.permute.xlu0 %411 }
 0x447   :  { %v414_v20 = vmul.f32 %v2648_v17, %v412_v19 }
 0x448   :  { %513 = vrot.lane.b32.xlu1 %v511_v18, %s2813_s3 }
 0x449   :  { %416 = vrot.lane.b32.xlu0 %v414_v20, %s2813_s3 }
 0x4ba   :  { %v514_v22 = vpop.permute.xlu1 %513 }
 0x4bb   :  { %v3005_v24 = vadd.f32 %v514_v22, %v506_v21  ;;  %v417_v25 = vpop.permute.xlu0 %416 }
 0x4bc   :  { %v3007_v26 = vadd.f32 %v417_v25, %v409_v23  ;;  %v182_v23 = vadd.f32 %v2961_v50, %v2927_v13 }
 0x4bd   :  { %2649 = vtanh.f32 %v3005_v24 }
 0x4be   :  { %2651 = vtanh.f32 %v3007_v26 }
 0x4c7   :  { %v2650_v27 = vpop.eup %2649 }
 0x4c8   :  { %v2652_v29 = vpop.eup %2651  ;;  %519 = vrot.lane.b32.xlu1 %v2650_v27, %s2812_s17 }
 0x4c9   :  { %422 = vrot.lane.b32.xlu0 %v2652_v29, %s2812_s17 }
 0x53a   :  { %v520_v30 = vpop.permute.xlu1 %519 }
 0x53b   :  { %v522_v31 = vmul.f32 %v2646_v15, %v520_v30  ;;  %v423_v28 = vpop.permute.xlu0 %422 }
 0x53c   :  { %v3013_v33 = vmul.f32 %v2648_v17, %v423_v28 }
 0x53d   :  { %524 = vrot.lane.b32.xlu0 %v522_v31, %s2813_s3 }
 0x53e   :  { %528 = vrot.lane.b32.xlu1 %v3013_v33, %s2812_s17 }
 0x5af   :  { %v525_v34 = vpop.permute.xlu0 %524 }
 0x5b0   :  { %v529_v35 = vpop.permute.xlu1 %528  ;;  %2277 = vmatmul.mubr.msk.f32.vlgmr.msra.gmra.mrb[10].mxu0 %vm224_vm2, %v525_v34 }
 0x5b1   :  { %v531_v36 = vsel %vm224_vm2, %v525_v34, %v529_v35  ;;  %2512 = vmatpush3.bf16.msra.mxu0 %v2935_v32  ;;  %2295 = vmatprep.mubr.msk.f32.mxu0 %vm2810_vm0, %v2811_v2 }
 0x5b2   :  { %2266 = vmatmul.mubr.msk.f32.vlgmr.msra.gmra.mrb[4].mxu1 %vm328_vm3, %v531_v36  ;;  %2513 = vmatprep.subr.bf16.mxu0 %v2809_v1 }
 0x5b3   :  { %2524 = vmatpush3.bf16.msra.mxu1 %v2898_v6  ;;  %2306 = vmatprep.mubr.msk.f32.mxu1 %vm2810_vm0, %v2811_v2 }
 0x5b4   :  { %2525 = vmatprep.subr.bf16.mxu1 %v2809_v1 }
 0x5b5   :  { %2515 = vmatpush3.bf16.msra.mxu0 %v2940_v37 }
 0x5b6   :  { %2516 = vmatprep.subr.bf16.mxu0 %v2809_v1 }
 0x5b7   :  { %2527 = vmatpush3.bf16.msra.mxu1 %v2909_v11 }
 0x5b8   :  { %2528 = vmatprep.subr.bf16.mxu1 %v2809_v1 }
 0x5b9   :  { %2518 = vmatpush3.bf16.msra.mxu0 %v2946_v42 }
 0x5ba   :  { %2519 = vmatprep.subr.bf16.mxu0 %v2809_v1 }
 0x5bd   :  { %2521 = vmatpush3.bf16.msra.mxu0 %v2953_v47 }
 0x5be   :  { %2540 = vmatprep.subr.bf16.mxu0 %v2809_v1 }
 0x683   :  { %v697_v39 = vpop.f32.mrb[10].mxu0 }
 0x684   :  { %v701_v40 = vadd.f32 %v697_v39, %v177_v38  ;;  %v2278_v41 = vpop.f32.mrb[11].mxu0 }
 0x685   :  { %v601_v43 = vpop.f32.mrb[4].mxu1 }
 0x686   :  { %2653 = vtanh.f32 %v701_v40  ;;  %v602_v44 = vadd.f32 %v2997_v59, %v601_v43  ;;  %v2267_v45 = vpop.f32.mrb[5].mxu1  ;;  %v2029_v49 = vmul.f32 -1.442695, %v701_v40 }
 0x688   :  { %2655 = vtanh.f32 %v602_v44  ;;  %v2027_v56 = vmul.f32 -1.442695, %v602_v44 }
 0x689   :  { %2657 = vpow2.f32 %v2029_v49 }
 0x68a   :  { %2659 = vpow2.f32 %v2027_v56 }
 0x690   :  { %v2654_v46 = vpop.eup %2653 }
 0x691   :  { %711 = vrot.lane.b32.xlu1 %v2654_v46, %s2812_s17 }
 0x692   :  { %v2656_v48 = vpop.eup %2655 }
 0x693   :  { %614 = vrot.lane.b32.xlu0 %v2656_v48, %s2812_s17  ;;  %v2658_v51 = vpop.eup %2657 }
 0x694   :  { %v2660_v57 = vpop.eup %2659  ;;  %v705_v58 = vadd.f32 1.0, %v2658_v51 }
 0x695   :  { %v608_v60 = vadd.f32 1.0, %v2660_v57 }
 0x696   :  { %2661 = vrcp.f32 %v705_v58 }
 0x697   :  { %2663 = vrcp.f32 %v608_v60 }
 0x6a0   :  { %v2662_v61 = vpop.eup %2661 }
 0x6a1   :  { %v2664_v0 = vpop.eup %2663  ;;  %v709_v5 = vmul.f32 %v2662_v61, %v3005_v24 }
 0x6a2   :  { %v612_v9 = vmul.f32 %v2664_v0, %v3007_v26 }
 0x703   :  { %v712_v62 = vpop.permute.xlu1 %711 }
 0x704   :  { %v714_v63 = vmul.f32 %v2662_v61, %v712_v62 }
 0x705   :  { %v615_v3 = vpop.permute.xlu0 %614 }
 0x706   :  { %716 = vrot.lane.b32.xlu1 %v714_v63, %s2813_s3  ;;  %v617_v4 = vmul.f32 %v2664_v0, %v615_v3 }
 0x708   :  { %619 = vrot.lane.b32.xlu0 %v617_v4, %s2813_s3 }
 0x778   :  { %v717_v7 = vpop.permute.xlu1 %716 }
 0x779   :  { %v3045_v8 = vadd.f32 %v717_v7, %v709_v5 }
 0x77a   :  { %v620_v10 = vpop.permute.xlu0 %619 }
 0x77b   :  { %2665 = vtanh.f32 %v3045_v8  ;;  %v3049_v12 = vadd.f32 %v620_v10, %v612_v9 }
 0x77d   :  { %2667 = vtanh.f32 %v3049_v12 }
 0x785   :  { %v2666_v14 = vpop.eup %2665 }
 0x786   :  { %722 = vrot.lane.b32.xlu1 %v2666_v14, %s2812_s17 }
 0x787   :  { %v2668_v15 = vpop.eup %2667 }
 0x788   :  { %625 = vrot.lane.b32.xlu0 %v2668_v15, %s2812_s17 }
 0x7f8   :  { %v723_v16 = vpop.permute.xlu1 %722 }
 0x7f9   :  { %v725_v17 = vmul.f32 %v2662_v61, %v723_v16 }
 0x7fa   :  { %v626_v18 = vpop.permute.xlu0 %625 }
 0x7fb   :  { %727 = vrot.lane.b32.xlu0 %v725_v17, %s2813_s3  ;;  %v3055_v19 = vmul.f32 %v2664_v0, %v626_v18 }
 0x7fd   :  { %731 = vrot.lane.b32.xlu1 %v3055_v19, %s2812_s17 }
 0x86d   :  { %v728_v20 = vpop.permute.xlu0 %727 }
 0x86e   :  { %2307 = vmatmul.mubr.msk.f32.vlgmr.msra.gmra.mrb[6].mxu1 %vm224_vm2, %v728_v20 }
 0x86f   :  { %2530 = vmatpush3.bf16.msra.mxu1 %v2935_v32  ;;  %2325 = vmatprep.mubr.msk.f32.mxu1 %vm2810_vm0, %v2811_v2  ;;  %v732_v21 = vpop.permute.xlu1 %731 }
 0x870   :  { %2531 = vmatprep.subr.bf16.mxu1 %v2809_v1  ;;  %v734_v22 = vsel %vm224_vm2, %v728_v20, %v732_v21 }
 0x871   :  { %2296 = vmatmul.mubr.msk.f32.vlgmr.msra.gmra.mrb[12].mxu0 %vm328_vm3, %v734_v22 }
 0x872   :  { %2542 = vmatpush3.bf16.msra.mxu0 %v2898_v6  ;;  %2336 = vmatprep.mubr.msk.f32.mxu0 %vm2810_vm0, %v2811_v2 }
 0x873   :  { %2533 = vmatpush3.bf16.msra.mxu1 %v2940_v37  ;;  %2543 = vmatprep.subr.bf16.mxu0 %v2809_v1 }
 0x874   :  { %2534 = vmatprep.subr.bf16.mxu1 %v2809_v1 }
 0x876   :  { %2545 = vmatpush3.bf16.msra.mxu0 %v2909_v11 }
 0x877   :  { %2536 = vmatpush3.bf16.msra.mxu1 %v2946_v42  ;;  %2546 = vmatprep.subr.bf16.mxu0 %v2809_v1 }
 0x878   :  { %2537 = vmatprep.subr.bf16.mxu1 %v2809_v1 }
 0x87b   :  { %2539 = vmatpush3.bf16.msra.mxu1 %v2953_v47 }
 0x87c   :  { %2558 = vmatprep.subr.bf16.mxu1 %v2809_v1 }
 0x941   :  { %v900_v24 = vpop.f32.mrb[6].mxu1 }
 0x942   :  { %v904_v25 = vadd.f32 %v900_v24, %v182_v23  ;;  %v2308_v26 = vpop.f32.mrb[7].mxu1 }
 0x944   :  { %2669 = vtanh.f32 %v904_v25  ;;  %v804_v27 = vpop.f32.mrb[12].mxu0  ;;  %v2033_v34 = vmul.f32 -1.442695, %v904_v25 }
 0x945   :  { %v805_v29 = vadd.f32 %v2997_v59, %v804_v27  ;;  %v2297_v30 = vpop.f32.mrb[13].mxu0 }
 0x947   :  { %2671 = vtanh.f32 %v805_v29  ;;  %v2031_v35 = vmul.f32 -1.442695, %v805_v29 }
 0x948   :  { %2673 = vpow2.f32 %v2033_v34 }
 0x949   :  { %2675 = vpow2.f32 %v2031_v35 }
 0x94e   :  { %v2670_v31 = vpop.eup %2669 }
 0x94f   :  { %914 = vrot.lane.b32.xlu1 %v2670_v31, %s2812_s17 }
 0x951   :  { %v2672_v28 = vpop.eup %2671 }
 0x952   :  { %817 = vrot.lane.b32.xlu0 %v2672_v28, %s2812_s17  ;;  %v2674_v50 = vpop.eup %2673 }
 0x953   :  { %v908_v36 = vadd.f32 1.0, %v2674_v50  ;;  %v2676_v38 = vpop.eup %2675 }
 0x954   :  { %v811_v39 = vadd.f32 1.0, %v2676_v38 }
 0x955   :  { %2677 = vrcp.f32 %v908_v36 }
 0x956   :  { %2679 = vrcp.f32 %v811_v39 }
 0x95f   :  { %v2678_v40 = vpop.eup %2677 }
 0x960   :  { %v2680_v44 = vpop.eup %2679  ;;  %v912_v48 = vmul.f32 %v2678_v40, %v3045_v8  ;;  %v187_v8 = vadd.f32 %v2927_v13, %v2967_v53 }
 0x961   :  { %v815_v51 = vmul.f32 %v2680_v44, %v3049_v12 }
 0x9c1   :  { %v915_v41 = vpop.permute.xlu1 %914 }
 0x9c2   :  { %v917_v43 = vmul.f32 %v2678_v40, %v915_v41 }
 0x9c4   :  { %919 = vrot.lane.b32.xlu1 %v917_v43, %s2813_s3  ;;  %v818_v45 = vpop.permute.xlu0 %817 }
 0x9c5   :  { %v820_v46 = vmul.f32 %v2680_v44, %v818_v45 }
 0x9c7   :  { %822 = vrot.lane.b32.xlu0 %v820_v46, %s2813_s3 }
 0xa36   :  { %v920_v49 = vpop.permute.xlu1 %919 }
 0xa37   :  { %v3086_v56 = vadd.f32 %v920_v49, %v912_v48 }
 0xa39   :  { %2681 = vtanh.f32 %v3086_v56  ;;  %v823_v57 = vpop.permute.xlu0 %822 }
 0xa3a   :  { %v3090_v58 = vadd.f32 %v823_v57, %v815_v51 }
 0xa3c   :  { %2683 = vtanh.f32 %v3090_v58 }
 0xa43   :  { %v2682_v60 = vpop.eup %2681 }
 0xa44   :  { %925 = vrot.lane.b32.xlu1 %v2682_v60, %s2812_s17 }
 0xa46   :  { %v2684_v61 = vpop.eup %2683 }
 0xa47   :  { %828 = vrot.lane.b32.xlu0 %v2684_v61, %s2812_s17 }
 0xab6   :  { %v926_v62 = vpop.permute.xlu1 %925 }
 0xab7   :  { %v928_v63 = vmul.f32 %v2678_v40, %v926_v62 }
 0xab9   :  { %930 = vrot.lane.b32.xlu0 %v928_v63, %s2813_s3  ;;  %v829_v0 = vpop.permute.xlu0 %828 }
 0xaba   :  { %v3096_v3 = vmul.f32 %v2680_v44, %v829_v0 }
 0xabc   :  { %934 = vrot.lane.b32.xlu1 %v3096_v3, %s2812_s17 }
 0xb2b   :  { %v931_v4 = vpop.permute.xlu0 %930 }
 0xb2c   :  { %2337 = vmatmul.mubr.msk.f32.vlgmr.msra.gmra.mrb[14].mxu0 %vm224_vm2, %v931_v4 }
 0xb2d   :  { %2548 = vmatpush3.bf16.msra.mxu0 %v2935_v32  ;;  %2355 = vmatprep.mubr.msk.f32.mxu0 %vm2810_vm0, %v2811_v2 }
 0xb2e   :  { %2549 = vmatprep.subr.bf16.mxu0 %v2809_v1  ;;  %v935_v5 = vpop.permute.xlu1 %934 }
 0xb2f   :  { %v937_v7 = vsel %vm224_vm2, %v931_v4, %v935_v5 }
 0xb30   :  { %2326 = vmatmul.mubr.msk.f32.vlgmr.msra.gmra.mrb[8].mxu1 %vm328_vm3, %v937_v7 }
 0xb31   :  { %2551 = vmatpush3.bf16.msra.mxu0 %v2940_v37  ;;  %2560 = vmatpush3.bf16.msra.mxu1 %v2898_v6 }
 0xb32   :  { %2552 = vmatprep.subr.bf16.mxu0 %v2809_v1  ;;  %2561 = vmatprep.subr.bf16.mxu1 %v2809_v1 }
 0xb33   :  { %2366 = vmatprep.mubr.msk.f32.mxu1 %vm2810_vm0, %v2811_v2 }
 0xb35   :  { %2554 = vmatpush3.bf16.msra.mxu0 %v2946_v42  ;;  %2563 = vmatpush3.bf16.msra.mxu1 %v2909_v11 }
 0xb36   :  { %2555 = vmatprep.subr.bf16.mxu0 %v2809_v1  ;;  %2564 = vmatprep.subr.bf16.mxu1 %v2809_v1 }
 0xb39   :  { %2557 = vmatpush3.bf16.msra.mxu0 %v2953_v47 }
 0xb3a   :  { %2576 = vmatprep.subr.bf16.mxu0 %v2809_v1 }
 0xbff   :  { %v1103_v9 = vpop.f32.mrb[14].mxu0 }
 0xc00   :  { %v1107_v10 = vadd.f32 %v1103_v9, %v187_v8  ;;  %v2338_v12 = vpop.f32.mrb[15].mxu0 }
 0xc02   :  { %2685 = vtanh.f32 %v1107_v10  ;;  %v2037_v20 = vmul.f32 -1.442695, %v1107_v10 }
 0xc03   :  { %v1007_v14 = vpop.f32.mrb[8].mxu1 }
 0xc04   :  { %v1008_v15 = vadd.f32 %v2997_v59, %v1007_v14  ;;  %v2327_v16 = vpop.f32.mrb[9].mxu1 }
 0xc06   :  { %2687 = vtanh.f32 %v1008_v15  ;;  %v2035_v21 = vmul.f32 -1.442695, %v1008_v15 }
 0xc07   :  { %2689 = vpow2.f32 %v2037_v20 }
 0xc08   :  { %2691 = vpow2.f32 %v2035_v21 }
 0xc0c   :  { %v2686_v17 = vpop.eup %2685 }
 0xc0d   :  { %1117 = vrot.lane.b32.xlu1 %v2686_v17, %s2812_s17 }
 0xc10   :  { %v2688_v18 = vpop.eup %2687 }
 0xc11   :  { %1020 = vrot.lane.b32.xlu0 %v2688_v18, %s2812_s17  ;;  %v2690_v53 = vpop.eup %2689 }
 0xc12   :  { %v1111_v22 = vadd.f32 1.0, %v2690_v53  ;;  %v2692_v23 = vpop.eup %2691 }
 0xc13   :  { %v1014_v24 = vadd.f32 1.0, %v2692_v23 }
 0xc14   :  { %2693 = vrcp.f32 %v1111_v22 }
 0xc15   :  { %2695 = vrcp.f32 %v1014_v24 }
 0xc1e   :  { %v2694_v25 = vpop.eup %2693 }
 0xc1f   :  { %v2696_v29 = vpop.eup %2695  ;;  %v1115_v28 = vmul.f32 %v2694_v25, %v3086_v56  ;;  %v192_v56 = vadd.f32 %v2965_v52, %v2927_v13 }
 0xc20   :  { %v1018_v50 = vmul.f32 %v2696_v29, %v3090_v58 }
 0xc7f   :  { %v1118_v26 = vpop.permute.xlu1 %1117 }
 0xc80   :  { %v1120_v27 = vmul.f32 %v2694_v25, %v1118_v26 }
 0xc82   :  { %1122 = vrot.lane.b32.xlu1 %v1120_v27, %s2813_s3 }
 0xc83   :  { %v1021_v30 = vpop.permute.xlu0 %1020 }
 0xc84   :  { %v1023_v31 = vmul.f32 %v2696_v29, %v1021_v30 }
 0xc86   :  { %1025 = vrot.lane.b32.xlu0 %v1023_v31, %s2813_s3 }
 0xcf4   :  { %v1123_v34 = vpop.permute.xlu1 %1122 }
 0xcf5   :  { %v3127_v35 = vadd.f32 %v1123_v34, %v1115_v28 }
 0xcf7   :  { %2697 = vtanh.f32 %v3127_v35 }
 0xcf8   :  { %v1026_v36 = vpop.permute.xlu0 %1025 }
 0xcf9   :  { %v3131_v38 = vadd.f32 %v1026_v36, %v1018_v50 }
 0xcfb   :  { %2699 = vtanh.f32 %v3131_v38 }
 0xd01   :  { %v2698_v39 = vpop.eup %2697 }
 0xd02   :  { %1128 = vrot.lane.b32.xlu1 %v2698_v39, %s2812_s17 }
 0xd05   :  { %v2700_v40 = vpop.eup %2699 }
 0xd06   :  { %1031 = vrot.lane.b32.xlu0 %v2700_v40, %s2812_s17 }
 0xd74   :  { %v1129_v41 = vpop.permute.xlu1 %1128 }
 0xd75   :  { %v1131_v43 = vmul.f32 %v2694_v25, %v1129_v41 }
 0xd77   :  { %1133 = vrot.lane.b32.xlu0 %v1131_v43, %s2813_s3 }
 0xd78   :  { %v1032_v44 = vpop.permute.xlu0 %1031 }
 0xd79   :  { %v3137_v45 = vmul.f32 %v2696_v29, %v1032_v44 }
 0xd7b   :  { %1137 = vrot.lane.b32.xlu1 %v3137_v45, %s2812_s17 }
 0xde9   :  { %v1134_v46 = vpop.permute.xlu0 %1133 }
 0xdea   :  { %2367 = vmatmul.mubr.msk.f32.vlgmr.msra.gmra.mrb[10].mxu1 %vm224_vm2, %v1134_v46 }
 0xdeb   :  { %2566 = vmatpush3.bf16.msra.mxu1 %v2935_v32  ;;  %2385 = vmatprep.mubr.msk.f32.mxu1 %vm2810_vm0, %v2811_v2 }
 0xdec   :  { %2567 = vmatprep.subr.bf16.mxu1 %v2809_v1 }
 0xded   :  { %v1138_v48 = vpop.permute.xlu1 %1137 }
 0xdee   :  { %v1140_v49 = vsel %vm224_vm2, %v1134_v46, %v1138_v48 }
 0xdef   :  { %2569 = vmatpush3.bf16.msra.mxu1 %v2940_v37  ;;  %2356 = vmatmul.mubr.msk.f32.vlgmr.msra.gmra.mrb[16].mxu0 %vm328_vm3, %v1140_v49 }
 0xdf0   :  { %2570 = vmatprep.subr.bf16.mxu1 %v2809_v1  ;;  %2578 = vmatpush3.bf16.msra.mxu0 %v2898_v6 }
 0xdf1   :  { %2396 = vmatprep.mubr.msk.f32.mxu0 %vm2810_vm0, %v2811_v2  ;;  %2579 = vmatprep.subr.bf16.mxu0 %v2809_v1 }
 0xdf3   :  { %2572 = vmatpush3.bf16.msra.mxu1 %v2946_v42 }
 0xdf4   :  { %2573 = vmatprep.subr.bf16.mxu1 %v2809_v1  ;;  %2581 = vmatpush3.bf16.msra.mxu0 %v2909_v11 }
 0xdf5   :  { %2582 = vmatprep.subr.bf16.mxu0 %v2809_v1 }
 0xdf7   :  { %2575 = vmatpush3.bf16.msra.mxu1 %v2953_v47 }
 0xdf8   :  { %2594 = vmatprep.subr.bf16.mxu1 %v2809_v1 }
 0xebd   :  { %v1306_v51 = vpop.f32.mrb[10].mxu1 }
 0xebe   :  { %v1310_v57 = vadd.f32 %v1306_v51, %v192_v56  ;;  %v2368_v58 = vpop.f32.mrb[11].mxu1 }
 0xec0   :  { %2701 = vtanh.f32 %v1310_v57  ;;  %v2041_v4 = vmul.f32 -1.442695, %v1310_v57 }
 0xec2   :  { %v1210_v60 = vpop.f32.mrb[16].mxu0 }
 0xec3   :  { %v1211_v61 = vadd.f32 %v2997_v59, %v1210_v60  ;;  %v2357_v62 = vpop.f32.mrb[17].mxu0 }
 0xec5   :  { %2703 = vtanh.f32 %v1211_v61  ;;  %v2039_v5 = vmul.f32 -1.442695, %v1211_v61 }
 0xec6   :  { %2705 = vpow2.f32 %v2041_v4 }
 0xec7   :  { %2707 = vpow2.f32 %v2039_v5 }
 0xeca   :  { %v2702_v63 = vpop.eup %2701 }
 0xecb   :  { %1320 = vrot.lane.b32.xlu1 %v2702_v63, %s2812_s17 }
 0xecf   :  { %v2704_v0 = vpop.eup %2703 }
 0xed0   :  { %1223 = vrot.lane.b32.xlu0 %v2704_v0, %s2812_s17  ;;  %v2706_v52 = vpop.eup %2705 }
 0xed1   :  { %v1314_v7 = vadd.f32 1.0, %v2706_v52  ;;  %v2708_v8 = vpop.eup %2707 }
 0xed2   :  { %v1217_v9 = vadd.f32 1.0, %v2708_v8 }
 0xed3   :  { %2709 = vrcp.f32 %v1314_v7 }
 0xed4   :  { %2711 = vrcp.f32 %v1217_v9 }
 0xedd   :  { %v2710_v10 = vpop.eup %2709 }
 0xede   :  { %v2712_v15 = vpop.eup %2711  ;;  %v1318_v18 = vmul.f32 %v2710_v10, %v3127_v35  ;;  %v197_v35 = vadd.f32 %v2927_v13, %v2971_v55 }
 0xedf   :  { %v1221_v53 = vmul.f32 %v2712_v15, %v3131_v38 }
 0xf3d   :  { %v1321_v12 = vpop.permute.xlu1 %1320 }
 0xf3e   :  { %v1323_v14 = vmul.f32 %v2710_v10, %v1321_v12 }
 0xf40   :  { %1325 = vrot.lane.b32.xlu1 %v1323_v14, %s2813_s3 }
 0xf42   :  { %v1224_v16 = vpop.permute.xlu0 %1223 }
 0xf43   :  { %v1226_v17 = vmul.f32 %v2712_v15, %v1224_v16 }
 0xf45   :  { %1228 = vrot.lane.b32.xlu0 %v1226_v17, %s2813_s3 }
 0xfb2   :  { %v1326_v20 = vpop.permute.xlu1 %1325 }
 0xfb3   :  { %v3168_v21 = vadd.f32 %v1326_v20, %v1318_v18 }
 0xfb5   :  { %2713 = vtanh.f32 %v3168_v21 }
 0xfb7   :  { %v1229_v22 = vpop.permute.xlu0 %1228 }
 0xfb8   :  { %v3172_v23 = vadd.f32 %v1229_v22, %v1221_v53 }
 0xfba   :  { %2715 = vtanh.f32 %v3172_v23 }
 0xfbf   :  { %v2714_v24 = vpop.eup %2713 }
 0xfc0   :  { %1331 = vrot.lane.b32.xlu1 %v2714_v24, %s2812_s17 }
 0xfc4   :  { %v2716_v25 = vpop.eup %2715 }
 0xfc5   :  { %1234 = vrot.lane.b32.xlu0 %v2716_v25, %s2812_s17 }
0x1032   :  { %v1332_v26 = vpop.permute.xlu1 %1331 }
0x1033   :  { %v1334_v27 = vmul.f32 %v2710_v10, %v1332_v26 }
0x1035   :  { %1336 = vrot.lane.b32.xlu0 %v1334_v27, %s2813_s3 }
0x1037   :  { %v1235_v29 = vpop.permute.xlu0 %1234 }
0x1038   :  { %v3178_v30 = vmul.f32 %v2712_v15, %v1235_v29 }
0x103a   :  { %1340 = vrot.lane.b32.xlu1 %v3178_v30, %s2812_s17 }
0x10a7   :  { %v1337_v31 = vpop.permute.xlu0 %1336 }
0x10a8   :  { %2397 = vmatmul.mubr.msk.f32.vlgmr.msra.gmra.mrb[18].mxu0 %vm224_vm2, %v1337_v31 }
0x10a9   :  { %2584 = vmatpush3.bf16.msra.mxu0 %v2935_v32  ;;  %2415 = vmatprep.mubr.msk.f32.mxu0 %vm2810_vm0, %v2811_v2 }
0x10aa   :  { %2585 = vmatprep.subr.bf16.mxu0 %v2809_v1 }
0x10ac   :  { %v1341_v28 = vpop.permute.xlu1 %1340 }
0x10ad   :  { %2587 = vmatpush3.bf16.msra.mxu0 %v2940_v37  ;;  %v1343_v34 = vsel %vm224_vm2, %v1337_v31, %v1341_v28 }
0x10ae   :  { %2588 = vmatprep.subr.bf16.mxu0 %v2809_v1  ;;  %2386 = vmatmul.mubr.msk.f32.vlgmr.msra.gmra.mrb[12].mxu1 %vm328_vm3, %v1343_v34 }
0x10af   :  { %2596 = vmatpush3.bf16.msra.mxu1 %v2898_v6  ;;  %2426 = vmatprep.mubr.msk.f32.mxu1 %vm2810_vm0, %v2811_v2 }
0x10b0   :  { %2597 = vmatprep.subr.bf16.mxu1 %v2809_v1 }
0x10b1   :  { %2590 = vmatpush3.bf16.msra.mxu0 %v2946_v42 }
0x10b2   :  { %2591 = vmatprep.subr.bf16.mxu0 %v2809_v1 }
0x10b3   :  { %2599 = vmatpush3.bf16.msra.mxu1 %v2909_v11 }
0x10b4   :  { %2600 = vmatprep.subr.bf16.mxu1 %v2809_v1 }
0x10b5   :  { %2593 = vmatpush3.bf16.msra.mxu0 %v2953_v47 }
0x117b   :  { %v1509_v50 = vpop.f32.mrb[18].mxu0 }
0x117c   :  { %v1513_v6 = vadd.f32 %v1509_v50, %v197_v35  ;;  %v2398_v36 = vpop.f32.mrb[19].mxu0 }
0x117e   :  { %2717 = vtanh.f32 %v1513_v6  ;;  %v2045_v43 = vmul.f32 -1.442695, %v1513_v6 }
0x1181   :  { %v1413_v38 = vpop.f32.mrb[12].mxu1 }
0x1182   :  { %v1414_v39 = vadd.f32 %v2997_v59, %v1413_v38  ;;  %v2387_v40 = vpop.f32.mrb[13].mxu1 }
0x1184   :  { %2719 = vtanh.f32 %v1414_v39  ;;  %v2043_v44 = vmul.f32 -1.442695, %v1414_v39 }
0x1185   :  { %2721 = vpow2.f32 %v2045_v43 }
0x1186   :  { %2723 = vpow2.f32 %v2043_v44 }
0x1188   :  { %v2718_v41 = vpop.eup %2717 }
0x1189   :  { %1523 = vrot.lane.b32.xlu1 %v2718_v41, %s2812_s17 }
0x118e   :  { %v2720_v11 = vpop.eup %2719 }
0x118f   :  { %1426 = vrot.lane.b32.xlu0 %v2720_v11, %s2812_s17  ;;  %v2722_v55 = vpop.eup %2721 }
0x1190   :  { %v1517_v46 = vadd.f32 1.0, %v2722_v55  ;;  %v2724_v48 = vpop.eup %2723 }
0x1191   :  { %v1420_v49 = vadd.f32 1.0, %v2724_v48 }
0x1192   :  { %2725 = vrcp.f32 %v1517_v46 }
0x1193   :  { %2727 = vrcp.f32 %v1420_v49 }
0x119c   :  { %v2726_v56 = vpop.eup %2725 }
0x119d   :  { %v2728_v58 = vpop.eup %2727  ;;  %v1521_v62 = vmul.f32 %v2726_v56, %v3168_v21 }
0x119e   :  { %v1424_v4 = vmul.f32 %v2728_v58, %v3172_v23 }
0x11fb   :  { %v1524_v51 = vpop.permute.xlu1 %1523 }
0x11fc   :  { %v1526_v57 = vmul.f32 %v2726_v56, %v1524_v51 }
0x11fe   :  { %1528 = vrot.lane.b32.xlu1 %v1526_v57, %s2813_s3 }
0x1201   :  { %v1427_v60 = vpop.permute.xlu0 %1426 }
0x1202   :  { %v1429_v61 = vmul.f32 %v2728_v58, %v1427_v60 }
0x1204   :  { %1431 = vrot.lane.b32.xlu0 %v1429_v61, %s2813_s3 }
0x1270   :  { %v1529_v63 = vpop.permute.xlu1 %1528 }
0x1271   :  { %v1531_v0 = vadd.f32 %v1529_v63, %v1521_v62 }
0x1273   :  { %2729 = vtanh.f32 %v1531_v0 }
0x1276   :  { %v1432_v5 = vpop.permute.xlu0 %1431 }
0x1277   :  { %v1434_v52 = vadd.f32 %v1432_v5, %v1424_v4  ;;  %v1848_v4 = vld [vmem:[%s3317_s6 + $0x8] sm:$0xff] }
0x1279   :  { %2731 = vtanh.f32 %v1434_v52 }
0x127d   :  { %v2730_v7 = vpop.eup %2729 }
0x127e   :  { %1534 = vrot.lane.b32.xlu1 %v2730_v7, %s2812_s17 }
0x1283   :  { %v2732_v8 = vpop.eup %2731 }
0x1284   :  { %1437 = vrot.lane.b32.xlu0 %v2732_v8, %s2812_s17 }
0x12f0   :  { %v1535_v9 = vpop.permute.xlu1 %1534 }
0x12f1   :  { %v1537_v10 = vmul.f32 %v2726_v56, %v1535_v9 }
0x12f3   :  { %1539 = vrot.lane.b32.xlu0 %v1537_v10, %s2813_s3 }
0x12f6   :  { %v1438_v12 = vpop.permute.xlu0 %1437 }
0x12f7   :  { %v3212_v14 = vmul.f32 %v2728_v58, %v1438_v12 }
0x12f9   :  { %1543 = vrot.lane.b32.xlu1 %v3212_v14, %s2812_s17 }
0x1365   :  { %v1540_v15 = vpop.permute.xlu0 %1539 }
0x1366   :  { %2427 = vmatmul.mubr.msk.f32.vlgmr.msra.gmra.mrb[14].mxu1 %vm224_vm2, %v1540_v15 }
0x1367   :  { %2602 = vmatpush3.bf16.msra.mxu1 %v2935_v32  ;;  %2445 = vmatprep.mubr.msk.f32.mxu1 %vm2810_vm0, %v2811_v2  ;;  %v202_v2 = vadd.f32 %v2969_v54, %v2927_v13 }
0x1368   :  { %2603 = vmatprep.subr.bf16.mxu1 %v2809_v1 }
0x136b   :  { %2605 = vmatpush3.bf16.msra.mxu1 %v2940_v37  ;;  %v1544_v16 = vpop.permute.xlu1 %1543 }
0x136c   :  { %2606 = vmatprep.subr.bf16.mxu1 %v2809_v1  ;;  %v1546_v17 = vsel %vm224_vm2, %v1540_v15, %v1544_v16 }
0x136d   :  { %2416 = vmatmul.mubr.msk.f32.vlgmr.msra.gmra.mrb[20].mxu0 %vm328_vm3, %v1546_v17 }
0x136f   :  { %2608 = vmatpush3.bf16.msra.mxu1 %v2946_v42 }
0x1370   :  { %2609 = vmatprep.subr.bf16.mxu1 %v2809_v1 }
0x1373   :  { %2611 = vmatpush3.bf16.msra.mxu1 %v2953_v47 }
0x1439   :  { %v1712_v32 = vpop.f32.mrb[14].mxu1 }
0x143a   :  { %v1716_v18 = vadd.f32 %v1712_v32, %v202_v2  ;;  %v2428_v20 = vpop.f32.mrb[15].mxu1 }
0x143c   :  { %2733 = vtanh.f32 %v1716_v18  ;;  %v2049_v1 = vmul.f32 -1.442695, %v1716_v18  ;;  %v2052_v18 = vld [vmem:[#allocation2] ss:$0 sm:$0xff] }
0x1440   :  { %v1616_v37 = vpop.f32.mrb[20].mxu0 }
0x1441   :  { %v1617_v21 = vadd.f32 %v2997_v59, %v1616_v37  ;;  %v2417_v53 = vpop.f32.mrb[21].mxu0 }
0x1443   :  { %2735 = vtanh.f32 %v1617_v21  ;;  %v2047_v47 = vmul.f32 -1.442695, %v1617_v21 }
0x1444   :  { %2737 = vpow2.f32 %v2049_v1 }
0x1445   :  { %2739 = vpow2.f32 %v2047_v47 }
0x1446   :  { %v2734_v22 = vpop.eup %2733 }
0x1447   :  { %1726 = vrot.lane.b32.xlu1 %v2734_v22, %s2812_s17 }
0x144d   :  { %v2736_v42 = vpop.eup %2735 }
0x144e   :  { %1629 = vrot.lane.b32.xlu0 %v2736_v42, %s2812_s17  ;;  %v2738_v13 = vpop.eup %2737 }
0x144f   :  { %v1720_v54 = vadd.f32 1.0, %v2738_v13  ;;  %v2740_v23 = vpop.eup %2739 }
0x1450   :  { %v1623_v24 = vadd.f32 1.0, %v2740_v23 }
0x1451   :  { %2741 = vrcp.f32 %v1720_v54 }
0x1452   :  { %2743 = vrcp.f32 %v1623_v24 }
0x145b   :  { %v2742_v25 = vpop.eup %2741 }
0x145c   :  { %v2744_v29 = vpop.eup %2743  ;;  %v1724_v34 = vmul.f32 %v2742_v25, %v1531_v0 }
0x145d   :  { %v1627_v6 = vmul.f32 %v2744_v29, %v1434_v52 }
0x14b9   :  { %v1727_v26 = vpop.permute.xlu1 %1726 }
0x14ba   :  { %v1729_v27 = vmul.f32 %v2742_v25, %v1727_v26 }
0x14bc   :  { %1731 = vrot.lane.b32.xlu1 %v1729_v27, %s2813_s3 }
0x14c0   :  { %v1630_v31 = vpop.permute.xlu0 %1629 }
0x14c1   :  { %v1632_v28 = vmul.f32 %v2744_v29, %v1630_v31 }
0x14c3   :  { %1634 = vrot.lane.b32.xlu0 %v1632_v28, %s2813_s3 }
0x152e   :  { %v1732_v35 = vpop.permute.xlu1 %1731 }
0x152f   :  { %v1734_v50 = vadd.f32 %v1732_v35, %v1724_v34 }
0x1531   :  { %2745 = vtanh.f32 %v1734_v50 }
0x1535   :  { %v1635_v36 = vpop.permute.xlu0 %1634 }
0x1536   :  { %v1637_v38 = vadd.f32 %v1635_v36, %v1627_v6 }
0x1538   :  { %2747 = vtanh.f32 %v1637_v38 }
0x153b   :  { %v2746_v39 = vpop.eup %2745 }
0x153c   :  { %1737 = vrot.lane.b32.xlu1 %v2746_v39, %s2812_s17 }
0x1542   :  { %v2748_v40 = vpop.eup %2747 }
0x1543   :  { %1640 = vrot.lane.b32.xlu0 %v2748_v40, %s2812_s17 }
0x15ae   :  { %v1738_v41 = vpop.permute.xlu1 %1737 }
0x15af   :  { %v1740_v11 = vmul.f32 %v2742_v25, %v1738_v41 }
0x15b1   :  { %1742 = vrot.lane.b32.xlu0 %v1740_v11, %s2813_s3 }
0x15b5   :  { %v1641_v43 = vpop.permute.xlu0 %1640 }
0x15b6   :  { %v1643_v44 = vmul.f32 %v2744_v29, %v1641_v43 }
0x15b8   :  { %1746 = vrot.lane.b32.xlu1 %v1643_v44, %s2812_s17 }
0x1623   :  { %v1743_v55 = vpop.permute.xlu0 %1742 }
0x162a   :  { %v1747_v46 = vpop.permute.xlu1 %1746 }
0x162b   :  { %v1749_v48 = vsel %vm224_vm2, %v1743_v55, %v1747_v46 }
0x162c   :  { %2446 = vmatmul.mubr.msk.f32.vlgmr.msra.gmra.mrb[16].mxu1 %vm328_vm3, %v1749_v48 }
0x16ff   :  { %v1819_v49 = vpop.f32.mrb[16].mxu1 }
0x1700   :  { %v1820_v56 = vadd.f32 %v2997_v59, %v1819_v49  ;;  %v2447_v51 = vpop.f32.mrb[17].mxu1  ;;  %v1847_v59 = vld [vmem:[%s3317_s6] sm:$0xff] }
0x1701   :  { %v2612_v5 = vpack.c.bf16 %v1848_v4, %v1847_v59 }
0x1702   :  { %2749 = vtanh.f32 %v1820_v56  ;;  %v2051_v58 = vmul.f32 -1.442695, %v1820_v56 }
0x1703   :  { %2613 = vmatprep.subr.bf16.mxu0 %v2612_v5 }
0x1704   :  { %2751 = vpow2.f32 %v2051_v58  ;;  %2615 = vmatpush3.bf16.msra.mxu0 %v2612_v5 }
0x170c   :  { %v2750_v57 = vpop.eup %2749 }
0x170d   :  { %1832 = vrot.lane.b32.xlu0 %v2750_v57, %s2812_s17 }
0x170e   :  { %v2752_v60 = vpop.eup %2751 }
0x170f   :  { %v1826_v61 = vadd.f32 1.0, %v2752_v60 }
0x1711   :  { %2753 = vrcp.f32 %v1826_v61 }
0x171b   :  { %v2754_v62 = vpop.eup %2753 }
0x177f   :  { %v1833_v63 = vpop.permute.xlu0 %1832 }
0x1780   :  { %v1835_v0 = vmul.f32 %v2754_v62, %v1833_v63 }
0x1782   :  { %1837 = vrot.lane.b32.xlu1 %v1835_v0, %s2813_s3 }
0x1786   :  { %1859 = vrot.lane.b32.xlu1 %v3013_v33, %s2813_s3  ;;  %v1849_v33 = vld [vmem:[%s3317_s6 + $0x10] sm:$0xff] }
0x178a   :  { %1863 = vrot.lane.b32.xlu1 %v3096_v3, %s2813_s3  ;;  %v1850_v3 = vld [vmem:[%s3317_s6 + $0x18] sm:$0xff] }
0x178b   :  { %v2616_v52 = vpack.c.bf16 %v1850_v3, %v1849_v33 }
0x178d   :  { %2617 = vmatprep.subr.bf16.mxu0 %v2616_v52 }
0x178e   :  { %1867 = vrot.lane.b32.xlu1 %v3178_v30, %s2813_s3  ;;  %v1830_v30 = vmul.f32 %v2754_v62, %v1637_v38  ;;  %2619 = vmatpush3.bf16.msra.mxu0 %v2616_v52 }
0x1792   :  { %1871 = vrot.lane.b32.xlu1 %v1643_v44, %s2813_s3 }
0x17f4   :  { %v1838_v7 = vpop.permute.xlu1 %1837 }
0x17f5   :  { %v1840_v8 = vadd.f32 %v1838_v7, %v1830_v30 }
0x17f7   :  { %2755 = vtanh.f32 %v1840_v8 }
0x17f8   :  { %v1860_v9 = vpop.permute.xlu1 %1859 }
0x17f9   :  { %2456 = vmatprep.mubr.msk.f32.mxu0 %vm224_vm2, %v1860_v9 }
0x17fc   :  { %v1864_v15 = vpop.permute.xlu1 %1863 }
0x1800   :  { %v1868_v2 = vpop.permute.xlu1 %1867 }
0x1801   :  { %v2756_v10 = vpop.eup %2755 }
0x1802   :  { %1843 = vrot.lane.b32.xlu0 %v2756_v10, %s2812_s17 }
0x1806   :  { %1861 = vrot.lane.b32.xlu0 %v3055_v19, %s2813_s3 }
0x180a   :  { %1865 = vrot.lane.b32.xlu0 %v3137_v45, %s2813_s3  ;;  %v1872_v45 = vpop.permute.xlu1 %1871 }
0x180e   :  { %1869 = vrot.lane.b32.xlu0 %v3212_v14, %s2813_s3 }
0x1874   :  { %v1844_v12 = vpop.permute.xlu0 %1843 }
0x1875   :  { %v1846_v16 = vmul.f32 %v2754_v62, %v1844_v12 }
0x1877   :  { %1873 = vrot.lane.b32.xlu0 %v1846_v16, %s2813_s3 }
0x1878   :  { %v1862_v17 = vpop.permute.xlu0 %1861 }
0x1879   :  { %2457 = vmatmul.mubr.msk.f32.vlgmr.msra.gmra.mrb[22].mxu0 %vm224_vm2, %v1862_v17 }
0x187a   :  { %2459 = vmatprep.mubr.msk.f32.mxu0 %vm224_vm2, %v1864_v15 }
0x187c   :  { %v1866_v32 = vpop.permute.xlu0 %1865 }
0x187d   :  { %2460 = vmatmul.mubr.msk.f32.gmra.mrb[24].mxu0 %vm224_vm2, %v1866_v32 }
0x187e   :  { %2462 = vmatprep.mubr.msk.f32.mxu0 %vm224_vm2, %v1868_v2 }
0x1880   :  { %v1870_v19 = vpop.permute.xlu0 %1869 }
0x1881   :  { %2463 = vmatmul.mubr.msk.f32.gmra.mrb[26].mxu0 %vm224_vm2, %v1870_v19 }
0x1882   :  { %2465 = vmatprep.mubr.msk.f32.mxu0 %vm224_vm2, %v1872_v45 }
0x18e9   :  { %v1874_v14 = vpop.permute.xlu0 %1873 }
0x18ea   :  { %2466 = vmatmul.mubr.msk.f32.gmra.mrb[28].mxu0 %vm224_vm2, %v1874_v14 }
0x194c   :  { %v2458_v20 = vpop.f32.mrb[22].mxu0 }
0x194d   :  { %v1963_v37 = vadd.f32 %v2458_v20, %v2052_v18  ;;  %v1957_v21 = vpop.f32.mrb[23].mxu0 }
0x194e   :  { %v1958_v53 = vadd.f32 %v2052_v18, %v1957_v21 }
0x194f   :  { %1998 = vst.msk [vmem:[%s3319_s8 + $0x8] sm:$0xff] %vm1996_vm4, %v1963_v37 }
0x1950   :  { %1997 = vst.msk [vmem:[%s3319_s8] sm:$0xff] %vm1996_vm4, %v1958_v53  ;;  %v2461_v22 = vpop.f32.mrb[24].mxu0 }
0x1951   :  { %v1973_v42 = vadd.f32 %v2461_v22, %v2052_v18  ;;  %v1967_v1 = vpop.f32.mrb[25].mxu0 }
0x1952   :  { %v1968_v47 = vadd.f32 %v2052_v18, %v1967_v1 }
0x1953   :  { %2000 = vst.msk [vmem:[%s3319_s8 + $0x18] sm:$0xff] %vm1996_vm4, %v1973_v42 }
0x1954   :  { %1999 = vst.msk [vmem:[%s3319_s8 + $0x10] sm:$0xff] %vm1996_vm4, %v1968_v47  ;;  %v2464_v13 = vpop.f32.mrb[26].mxu0 }
0x1955   :  { %v1983_v54 = vadd.f32 %v2464_v13, %v2052_v18  ;;  %v1977_v23 = vpop.f32.mrb[27].mxu0 }
0x1956   :  { %v1978_v24 = vadd.f32 %v2052_v18, %v1977_v23 }
0x1957   :  { %2002 = vst.msk [vmem:[%s3319_s8 + $0x28] sm:$0xff] %vm1996_vm4, %v1983_v54 }
0x1958   :  { %2001 = vst.msk [vmem:[%s3319_s8 + $0x20] sm:$0xff] %vm1996_vm4, %v1978_v24 }
0x19bd   :  { %v2467_v25 = vpop.f32.mrb[28].mxu0 }
0x19be   :  { %v1993_v26 = vadd.f32 %v2467_v25, %v2052_v18  ;;  %v1987_v27 = vpop.f32.mrb[29].mxu0 }
0x19bf   :  { %v1988_v29 = vadd.f32 %v2052_v18, %v1987_v27 }
0x19c0   :  { %2004 = vst.msk [vmem:[%s3319_s8 + $0x38] sm:$0xff] %vm1996_vm4, %v1993_v26 }
0x19c1   :  { %2003 = vst.msk [vmem:[%s3319_s8 + $0x30] sm:$0xff] %vm1996_vm4, %v1988_v29 }
0x19c2   :  { %2009 = vsyncpa [#allocation4], 1 }
0x19c3   :  { %2010 = vsyncpa [#allocation6], 1 }

</bundles_post_ra>
